<compile_context>
chip_gen: v7x
topology: tpu7x:2x2x1
jax: 0.10.0
libtpu: 0.0.40
codegen_flags: <defaults>
</compile_context>

<pallas_src>
import jax
import jax.numpy as jnp
from jax.experimental import pallas as pl
from jax.experimental.pallas import tpu as pltpu

# ----- synthetic hyperparameters (the module's globals) ---------------------
LATENT_DIM = 8                      # z_dim
PLAN_DECODER = [32, 32, 32, 32]     # hidden widths for fc5..fc8
INPUT_DIM = 16                      # output dim of fc9 (flattened x dim)

TB = 256                            # batch tile: 256-aligned (v6e/v7x), 128-aligned (v5e)


# ----- Pallas kernel: the full MLP forward on one batch tile -----------------
def _density_nn_kernel(z_ref,
                       w5_ref, b5_ref,
                       w6_ref, b6_ref,
                       w7_ref, b7_ref,
                       w8_ref, b8_ref,
                       w9_ref, b9_ref,
                       out_ref):
    z = z_ref[...]

    h5 = jnp.maximum(
        jnp.dot(z, w5_ref[...], preferred_element_type=jnp.float32) + b5_ref[...], 0.0)
    h6 = jnp.maximum(
        jnp.dot(h5, w6_ref[...], preferred_element_type=jnp.float32) + b6_ref[...], 0.0)
    h7 = jnp.maximum(
        jnp.dot(h6, w7_ref[...], preferred_element_type=jnp.float32) + b7_ref[...], 0.0)
    h8 = jnp.maximum(
        jnp.dot(h7, w8_ref[...], preferred_element_type=jnp.float32) + b8_ref[...], 0.0)
    logits = jnp.dot(h8, w9_ref[...], preferred_element_type=jnp.float32) + b9_ref[...]

    out_ref[...] = jax.nn.sigmoid(logits).astype(out_ref.dtype)


# ----- wrapper ---------------------------------------------------------------
def stochastic_density_nn_forward(z, params):
    """z: (B, LATENT_DIM) f32 -> recon_x: (B, INPUT_DIM) f32."""
    B = z.shape[0]
    (w5, b5), (w6, b6), (w7, b7), (w8, b8), (w9, b9) = params

    # Pad the batch so B_pad % TB == 0 (padded rows are computed but discarded).
    num_tiles = pl.cdiv(B, TB)
    B_pad = num_tiles * TB
    if B_pad != B:
        z = jnp.pad(z, ((0, B_pad - B), (0, 0)))

    # Weights / biases: constant index_map -> DMA'd once, stay VMEM-resident.
    const2d = lambda a: pl.BlockSpec(a.shape, lambda i: (0, 0))

    # Advisory cost estimate for the XLA scheduler.
    dims = [LATENT_DIM] + PLAN_DECODER + [INPUT_DIM]
    flops = 2 * B_pad * sum(dims[i] * dims[i + 1] for i in range(len(dims) - 1))
    weight_bytes = sum(int(w.size) + int(b.size) for (w, b) in params) * 4
    bytes_accessed = B_pad * (LATENT_DIM + INPUT_DIM) * 4 + weight_bytes

    out = pl.pallas_call(
        _density_nn_kernel,
        out_shape=jax.ShapeDtypeStruct((B_pad, INPUT_DIM), jnp.float32),
        grid=(num_tiles,),
        in_specs=[pl.BlockSpec((TB, LATENT_DIM), lambda i: (i, 0)),
                  const2d(w5), const2d(b5),
                  const2d(w6), const2d(b6),
                  const2d(w7), const2d(b7),
                  const2d(w8), const2d(b8),
                  const2d(w9), const2d(b9)],
        out_specs=pl.BlockSpec((TB, INPUT_DIM), lambda i: (i, 0)),
        compiler_params=pltpu.CompilerParams(
            dimension_semantics=("parallel",)),
        cost_estimate=pl.CostEstimate(
            flops=flops,
            transcendentals=B_pad * INPUT_DIM,
            bytes_accessed=bytes_accessed),
    )(z, w5, b5, w6, b6, w7, b7, w8, b8, w9, b9)

    return out[:B] if B_pad != B else out


# ----- deterministic parameter init (PyTorch nn.Linear-style uniform) --------
def _init_linear(key, in_dim, out_dim):
    kw, kb = jax.random.split(key)
    bound = 1.0 / jnp.sqrt(jnp.float32(in_dim))
    # stored as (in_dim, out_dim): equivalent to PyTorch weight (out,in) transposed
    w = jax.random.uniform(kw, (in_dim, out_dim), jnp.float32, -bound, bound)
    b = jax.random.uniform(kb, (1, out_dim), jnp.float32, -bound, bound)
    return w, b


def make_params(key):
    dims = [LATENT_DIM] + PLAN_DECODER + [INPUT_DIM]
    keys = jax.random.split(key, len(dims) - 1)
    return [_init_linear(k, dims[i], dims[i + 1]) for i, k in enumerate(keys)]


# ----- pure-JAX reference for sanity ------------------------------------------
def _reference(z, params):
    h = z
    for (w, b) in params[:-1]:
        h = jax.nn.relu(h @ w + b)
    w, b = params[-1]
    return jax.nn.sigmoid(h @ w + b)


if __name__ == "__main__":
    key = jax.random.PRNGKey(0)
    kz, kz2, kp = jax.random.split(key, 3)

    params = make_params(kp)

    # Small-batch check (tail-padding path, single grid step).
    batch = 2
    z = jax.random.normal(kz, (batch, LATENT_DIM), jnp.float32)
    out = jax.block_until_ready(stochastic_density_nn_forward(z, params))
    ref = _reference(z, params)
    assert out.shape == (batch, INPUT_DIM)
    assert jnp.allclose(out, ref, atol=1e-5, rtol=1e-5)

    # Larger, non-multiple-of-TB batch to exercise multiple pipelined grid steps.
    batch2 = 515
    z2 = jax.random.normal(kz2, (batch2, LATENT_DIM), jnp.float32)
    out2 = jax.block_until_ready(stochastic_density_nn_forward(z2, params))
    ref2 = _reference(z2, params)
    assert out2.shape == (batch2, INPUT_DIM)
    assert jnp.allclose(out2, ref2, atol=1e-5, rtol=1e-5)

    # NOTE: reparameterization_trick / log_likelihood* are auxiliary methods not
    # used in forward(); forward() semantics are fully reproduced above.
    print("KERNEL_OK")
</pallas_src>

<mosaic_0001>
module attributes {stable_mosaic.version = 11 : i64} {
  func.func @_density_nn_kernel(%arg0: i32, %arg1: memref<256x8xf32, #tpu.memory_space<vmem>>, %arg2: memref<8x32xf32, #tpu.memory_space<vmem>>, %arg3: memref<1x32xf32, #tpu.memory_space<vmem>>, %arg4: memref<32x32xf32, #tpu.memory_space<vmem>>, %arg5: memref<1x32xf32, #tpu.memory_space<vmem>>, %arg6: memref<32x32xf32, #tpu.memory_space<vmem>>, %arg7: memref<1x32xf32, #tpu.memory_space<vmem>>, %arg8: memref<32x32xf32, #tpu.memory_space<vmem>>, %arg9: memref<1x32xf32, #tpu.memory_space<vmem>>, %arg10: memref<32x16xf32, #tpu.memory_space<vmem>>, %arg11: memref<1x16xf32, #tpu.memory_space<vmem>>, %arg12: memref<256x16xf32, #tpu.memory_space<vmem>>) attributes {dimension_semantics = [#tpu.dimension_semantics<parallel>], iteration_bounds = array<i64: 1>, scalar_prefetch = 0 : i64, scratch_operands = 0 : i64, tpu.core_type = #tpu.core_type<tc>, window_params = [{transform_indices = @transform_0, window_bounds = array<i64: 256, 8>}, {pipeline_mode = #tpu.pipeline_mode<synchronous>, transform_indices = @transform_1, window_bounds = array<i64: 8, 32>}, {pipeline_mode = #tpu.pipeline_mode<synchronous>, transform_indices = @transform_2, window_bounds = array<i64: 1, 32>}, {pipeline_mode = #tpu.pipeline_mode<synchronous>, transform_indices = @transform_3, window_bounds = array<i64: 32, 32>}, {pipeline_mode = #tpu.pipeline_mode<synchronous>, transform_indices = @transform_4, window_bounds = array<i64: 1, 32>}, {pipeline_mode = #tpu.pipeline_mode<synchronous>, transform_indices = @transform_5, window_bounds = array<i64: 32, 32>}, {pipeline_mode = #tpu.pipeline_mode<synchronous>, transform_indices = @transform_6, window_bounds = array<i64: 1, 32>}, {pipeline_mode = #tpu.pipeline_mode<synchronous>, transform_indices = @transform_7, window_bounds = array<i64: 32, 32>}, {pipeline_mode = #tpu.pipeline_mode<synchronous>, transform_indices = @transform_8, window_bounds = array<i64: 1, 32>}, {pipeline_mode = #tpu.pipeline_mode<synchronous>, transform_indices = @transform_9, window_bounds = array<i64: 32, 16>}, {pipeline_mode = #tpu.pipeline_mode<synchronous>, transform_indices = @transform_10, window_bounds = array<i64: 1, 16>}, {transform_indices = @transform_11, window_bounds = array<i64: 256, 16>}]} {
    %c0 = arith.constant 0 : index
    %c0_0 = arith.constant 0 : index
    %0 = vector.load %arg1[%c0, %c0_0] : memref<256x8xf32, #tpu.memory_space<vmem>>, vector<256x8xf32>
    %c0_1 = arith.constant 0 : index
    %c0_2 = arith.constant 0 : index
    %1 = vector.load %arg2[%c0_1, %c0_2] : memref<8x32xf32, #tpu.memory_space<vmem>>, vector<8x32xf32>
    %cst = arith.constant dense<0.000000e+00> : vector<256x32xf32>
    %2 = tpu.matmul %0, %1, %cst {dimension_numbers = #tpu.dot_dimension_numbers<[1], [0], [0], [1], [0, 0, 1, 1], [], []>} : vector<256x8xf32>, vector<8x32xf32>, vector<256x32xf32> -> vector<256x32xf32>
    %c0_3 = arith.constant 0 : index
    %c0_4 = arith.constant 0 : index
    %3 = vector.load %arg3[%c0_3, %c0_4] : memref<1x32xf32, #tpu.memory_space<vmem>>, vector<1x32xf32>
    %4 = vector.broadcast %3 : vector<1x32xf32> to vector<256x32xf32>
    %5 = arith.addf %2, %4 : vector<256x32xf32>
    %cst_5 = arith.constant 0.000000e+00 : f32
    %6 = vector.broadcast %cst_5 : f32 to vector<256x32xf32>
    %7 = arith.maximumf %5, %6 : vector<256x32xf32>
    %c0_6 = arith.constant 0 : index
    %c0_7 = arith.constant 0 : index
    %8 = vector.load %arg4[%c0_6, %c0_7] : memref<32x32xf32, #tpu.memory_space<vmem>>, vector<32x32xf32>
    %cst_8 = arith.constant dense<0.000000e+00> : vector<256x32xf32>
    %9 = tpu.matmul %7, %8, %cst_8 {dimension_numbers = #tpu.dot_dimension_numbers<[1], [0], [0], [1], [0, 0, 1, 1], [], []>} : vector<256x32xf32>, vector<32x32xf32>, vector<256x32xf32> -> vector<256x32xf32>
    %c0_9 = arith.constant 0 : index
    %c0_10 = arith.constant 0 : index
    %10 = vector.load %arg5[%c0_9, %c0_10] : memref<1x32xf32, #tpu.memory_space<vmem>>, vector<1x32xf32>
    %11 = vector.broadcast %10 : vector<1x32xf32> to vector<256x32xf32>
    %12 = arith.addf %9, %11 : vector<256x32xf32>
    %cst_11 = arith.constant 0.000000e+00 : f32
    %13 = vector.broadcast %cst_11 : f32 to vector<256x32xf32>
    %14 = arith.maximumf %12, %13 : vector<256x32xf32>
    %c0_12 = arith.constant 0 : index
    %c0_13 = arith.constant 0 : index
    %15 = vector.load %arg6[%c0_12, %c0_13] : memref<32x32xf32, #tpu.memory_space<vmem>>, vector<32x32xf32>
    %cst_14 = arith.constant dense<0.000000e+00> : vector<256x32xf32>
    %16 = tpu.matmul %14, %15, %cst_14 {dimension_numbers = #tpu.dot_dimension_numbers<[1], [0], [0], [1], [0, 0, 1, 1], [], []>} : vector<256x32xf32>, vector<32x32xf32>, vector<256x32xf32> -> vector<256x32xf32>
    %c0_15 = arith.constant 0 : index
    %c0_16 = arith.constant 0 : index
    %17 = vector.load %arg7[%c0_15, %c0_16] : memref<1x32xf32, #tpu.memory_space<vmem>>, vector<1x32xf32>
    %18 = vector.broadcast %17 : vector<1x32xf32> to vector<256x32xf32>
    %19 = arith.addf %16, %18 : vector<256x32xf32>
    %cst_17 = arith.constant 0.000000e+00 : f32
    %20 = vector.broadcast %cst_17 : f32 to vector<256x32xf32>
    %21 = arith.maximumf %19, %20 : vector<256x32xf32>
    %c0_18 = arith.constant 0 : index
    %c0_19 = arith.constant 0 : index
    %22 = vector.load %arg8[%c0_18, %c0_19] : memref<32x32xf32, #tpu.memory_space<vmem>>, vector<32x32xf32>
    %cst_20 = arith.constant dense<0.000000e+00> : vector<256x32xf32>
    %23 = tpu.matmul %21, %22, %cst_20 {dimension_numbers = #tpu.dot_dimension_numbers<[1], [0], [0], [1], [0, 0, 1, 1], [], []>} : vector<256x32xf32>, vector<32x32xf32>, vector<256x32xf32> -> vector<256x32xf32>
    %c0_21 = arith.constant 0 : index
    %c0_22 = arith.constant 0 : index
    %24 = vector.load %arg9[%c0_21, %c0_22] : memref<1x32xf32, #tpu.memory_space<vmem>>, vector<1x32xf32>
    %25 = vector.broadcast %24 : vector<1x32xf32> to vector<256x32xf32>
    %26 = arith.addf %23, %25 : vector<256x32xf32>
    %cst_23 = arith.constant 0.000000e+00 : f32
    %27 = vector.broadcast %cst_23 : f32 to vector<256x32xf32>
    %28 = arith.maximumf %26, %27 : vector<256x32xf32>
    %c0_24 = arith.constant 0 : index
    %c0_25 = arith.constant 0 : index
    %29 = vector.load %arg10[%c0_24, %c0_25] : memref<32x16xf32, #tpu.memory_space<vmem>>, vector<32x16xf32>
    %cst_26 = arith.constant dense<0.000000e+00> : vector<256x16xf32>
    %30 = tpu.matmul %28, %29, %cst_26 {dimension_numbers = #tpu.dot_dimension_numbers<[1], [0], [0], [1], [0, 0, 1, 1], [], []>} : vector<256x32xf32>, vector<32x16xf32>, vector<256x16xf32> -> vector<256x16xf32>
    %c0_27 = arith.constant 0 : index
    %c0_28 = arith.constant 0 : index
    %31 = vector.load %arg11[%c0_27, %c0_28] : memref<1x16xf32, #tpu.memory_space<vmem>>, vector<1x16xf32>
    %32 = vector.broadcast %31 : vector<1x16xf32> to vector<256x16xf32>
    %33 = arith.addf %30, %32 : vector<256x16xf32>
    %34 = arith.negf %33 : vector<256x16xf32>
    %35 = math.exp %34 : vector<256x16xf32>
    %cst_29 = arith.constant 1.000000e+00 : f32
    %36 = vector.broadcast %cst_29 : f32 to vector<256x16xf32>
    %37 = arith.addf %36, %35 : vector<256x16xf32>
    %38 = arith.divf %36, %37 : vector<256x16xf32>
    %c0_30 = arith.constant 0 : index
    %c0_31 = arith.constant 0 : index
    %39 = vector.load %arg12[%c0_30, %c0_31] : memref<256x16xf32, #tpu.memory_space<vmem>>, vector<256x16xf32>
    tpu.vector_store %arg12[%c0_30, %c0_31], %38 {strides = array<i32>} : memref<256x16xf32, #tpu.memory_space<vmem>>, vector<256x16xf32>,
    return
  }
  func.func @transform_0(%arg0: i32) -> (i32, i32) {
    %c0_i32 = arith.constant 0 : i32
    %c0_i32_0 = arith.constant 0 : i32
    return %arg0, %c0_i32 : i32, i32
  }
  func.func @transform_1(%arg0: i32) -> (i32, i32) {
    %c0_i32 = arith.constant 0 : i32
    %c0_i32_0 = arith.constant 0 : i32
    %c0_i32_1 = arith.constant 0 : i32
    return %c0_i32, %c0_i32_0 : i32, i32
  }
  func.func @transform_2(%arg0: i32) -> (i32, i32) {
    %c0_i32 = arith.constant 0 : i32
    %c0_i32_0 = arith.constant 0 : i32
    %c0_i32_1 = arith.constant 0 : i32
    return %c0_i32, %c0_i32_0 : i32, i32
  }
  func.func @transform_3(%arg0: i32) -> (i32, i32) {
    %c0_i32 = arith.constant 0 : i32
    %c0_i32_0 = arith.constant 0 : i32
    %c0_i32_1 = arith.constant 0 : i32
    return %c0_i32, %c0_i32_0 : i32, i32
  }
  func.func @transform_4(%arg0: i32) -> (i32, i32) {
    %c0_i32 = arith.constant 0 : i32
    %c0_i32_0 = arith.constant 0 : i32
    %c0_i32_1 = arith.constant 0 : i32
    return %c0_i32, %c0_i32_0 : i32, i32
  }
  func.func @transform_5(%arg0: i32) -> (i32, i32) {
    %c0_i32 = arith.constant 0 : i32
    %c0_i32_0 = arith.constant 0 : i32
    %c0_i32_1 = arith.constant 0 : i32
    return %c0_i32, %c0_i32_0 : i32, i32
  }
  func.func @transform_6(%arg0: i32) -> (i32, i32) {
    %c0_i32 = arith.constant 0 : i32
    %c0_i32_0 = arith.constant 0 : i32
    %c0_i32_1 = arith.constant 0 : i32
    return %c0_i32, %c0_i32_0 : i32, i32
  }
  func.func @transform_7(%arg0: i32) -> (i32, i32) {
    %c0_i32 = arith.constant 0 : i32
    %c0_i32_0 = arith.constant 0 : i32
    %c0_i32_1 = arith.constant 0 : i32
    return %c0_i32, %c0_i32_0 : i32, i32
  }
  func.func @transform_8(%arg0: i32) -> (i32, i32) {
    %c0_i32 = arith.constant 0 : i32
    %c0_i32_0 = arith.constant 0 : i32
    %c0_i32_1 = arith.constant 0 : i32
    return %c0_i32, %c0_i32_0 : i32, i32
  }
  func.func @transform_9(%arg0: i32) -> (i32, i32) {
    %c0_i32 = arith.constant 0 : i32
    %c0_i32_0 = arith.constant 0 : i32
    %c0_i32_1 = arith.constant 0 : i32
    return %c0_i32, %c0_i32_0 : i32, i32
  }
  func.func @transform_10(%arg0: i32) -> (i32, i32) {
    %c0_i32 = arith.constant 0 : i32
    %c0_i32_0 = arith.constant 0 : i32
    %c0_i32_1 = arith.constant 0 : i32
    return %c0_i32, %c0_i32_0 : i32, i32
  }
  func.func @transform_11(%arg0: i32) -> (i32, i32) {
    %c0_i32 = arith.constant 0 : i32
    %c0_i32_0 = arith.constant 0 : i32
    return %arg0, %c0_i32 : i32, i32
  }
}

</mosaic_0001>

<bundles_post_ra>
// kernel: tpu_custom_call.1
= control target key start
LH: loop header
LB: loop body
LE: loop exit
PB: predicated region body
PF: predicated region fallthrough
CT: control target
= control target key end

     0   :  { %vm78_vm0 = vcmask 64512   ;;  %vm443_vm1 = vcmask 261120   ;;  %vm2049_vm2 = vcmask 130048   ;;  %s3588_s1 = inlined_call_operand.vmem [shape: f32[8,32], index: 1, kind: input, shape index: {}]   ;;  %s3589_s0 = inlined_call_operand.vmem [shape: f32[256,8], index: 0, kind: input, shape index: {}]   ;;  %s3590_s3 = inlined_call_operand.vmem [shape: f32[32,32], index: 3, kind: input, shape index: {}]   ;;  %s3591_s5 = inlined_call_operand.vmem [shape: f32[32,32], index: 5, kind: input, shape index: {}]   ;;  %s3592_s2 = inlined_call_operand.vmem [shape: f32[1,32], index: 2, kind: input, shape index: {}]   ;;  %s3593_s7 = inlined_call_operand.vmem [shape: f32[32,32], index: 7, kind: input, shape index: {}]   ;;  %s3594_s4 = inlined_call_operand.vmem [shape: f32[1,32], index: 4, kind: input, shape index: {}]   ;;  %s3595_s9 = inlined_call_operand.vmem [shape: f32[32,16], index: 9, kind: input, shape index: {}]   ;;  %s3596_s6 = inlined_call_operand.vmem [shape: f32[1,32], index: 6, kind: input, shape index: {}]   ;;  %s3597_s8 = inlined_call_operand.vmem [shape: f32[1,32], index: 8, kind: input, shape index: {}]   ;;  %s3598_s10 = inlined_call_operand.vmem [shape: f32[1,16], index: 10, kind: input, shape index: {}]   ;;  %s3599_s11 = inlined_call_operand.vmem [shape: f32[256,16], index: 11, kind: output, shape index: {}]  }
   0x1   :  { %v70_v0 = vld [vmem:[%s3588_s1] sm:$0xff]  ;;  %v39_v2 = vld [vmem:[%s3589_s0 + $0x8] sm:$0xff]  ;;  %v40_v3 = vld [vmem:[%s3589_s0 + $0x10] sm:$0xff] }
   0x2   :  { %v38_v1 = vld [vmem:[%s3589_s0] sm:$0xff]  ;;  %2460 = vmatprep.subr.mxu0 %v70_v0  ;;  %2766 = vmatprep.subr.mxu1 %v70_v0  ;;  %v41_v4 = vld [vmem:[%s3589_s0 + $0x18] sm:$0xff]  ;;  %v55_v7 = vld [vmem:[%s3589_s0 + $0x88] sm:$0xff] }
   0x3   :  { %2462 = vmatprep.mubr.msk.f32.mxu0 %vm78_vm0, %v38_v1  ;;  %2461 = vmatpush3.msra.mxu0 %v70_v0  ;;  %v42_v5 = vld [vmem:[%s3589_s0 + $0x20] sm:$0xff]  ;;  %v56_v8 = vld [vmem:[%s3589_s0 + $0x90] sm:$0xff]  ;;  %v43_v9 = vld [vmem:[%s3589_s0 + $0x28] sm:$0xff] }
   0x4   :  { %2463 = vmatmul.mubr.msk.f32.vlgmr.msra.gmra.mrb[0].mxu0 %vm78_vm0, %v39_v2  ;;  %2767 = vmatpush3.msra.mxu1 %v70_v0  ;;  %v54_v6 = vld [vmem:[%s3589_s0 + $0x80] sm:$0xff]  ;;  %v57_v10 = vld [vmem:[%s3589_s0 + $0x98] sm:$0xff]  ;;  %v44_v11 = vld [vmem:[%s3589_s0 + $0x30] sm:$0xff] }
   0x5   :  { %2465 = vmatprep.mubr.msk.f32.mxu0 %vm78_vm0, %v40_v3  ;;  %2486 = vmatprep.mubr.msk.f32.mxu1 %vm78_vm0, %v54_v6  ;;  %v58_v12 = vld [vmem:[%s3589_s0 + $0xa0] sm:$0xff]  ;;  %v433_v14 = vld [vmem:[%s3590_s3 + $0x8] sm:$0xff]  ;;  %v434_v15 = vld [vmem:[%s3590_s3 + $0x10] sm:$0xff] }
   0x6   :  { %2487 = vmatmul.mubr.msk.f32.vlgmr.msra.gmra.mrb[0].mxu1 %vm78_vm0, %v55_v7  ;;  %v432_v13 = vld [vmem:[%s3590_s3] sm:$0xff]  ;;  %v45_v16 = vld [vmem:[%s3589_s0 + $0x38] sm:$0xff]  ;;  %v59_v17 = vld [vmem:[%s3589_s0 + $0xa8] sm:$0xff] }
   0x7   :  { %2489 = vmatprep.mubr.msk.f32.mxu1 %vm78_vm0, %v56_v8  ;;  %v2734_v18 = vpack.c.bf16 %v433_v14, %v432_v13  ;;  %v435_v19 = vld [vmem:[%s3590_s3 + $0x18] sm:$0xff]  ;;  %v46_v20 = vld [vmem:[%s3589_s0 + $0x40] sm:$0xff]  ;;  %v60_v21 = vld [vmem:[%s3589_s0 + $0xb0] sm:$0xff] }
   0x8   :  { %2466 = vmatmul.mubr.msk.f32.gmra.mrb[2].mxu0 %vm78_vm0, %v41_v4  ;;  %v2738_v22 = vpack.c.bf16 %v435_v19, %v434_v15  ;;  %v47_v23 = vld [vmem:[%s3589_s0 + $0x48] sm:$0xff]  ;;  %v61_v24 = vld [vmem:[%s3589_s0 + $0xb8] sm:$0xff]  ;;  %v48_v25 = vld [vmem:[%s3589_s0 + $0x50] sm:$0xff] }
   0x9   :  { %2468 = vmatprep.mubr.msk.f32.mxu0 %vm78_vm0, %v42_v5  ;;  %2735 = vmatprep.subr.bf16.mxu1 %v2734_v18  ;;  %v62_v26 = vld [vmem:[%s3589_s0 + $0xc0] sm:$0xff]  ;;  %v49_v27 = vld [vmem:[%s3589_s0 + $0x58] sm:$0xff]  ;;  %v63_v28 = vld [vmem:[%s3589_s0 + $0xc8] sm:$0xff] }
   0xa   :  { %2490 = vmatmul.mubr.msk.f32.gmra.mrb[2].mxu1 %vm78_vm0, %v57_v10  ;;  %v50_v29 = vld [vmem:[%s3589_s0 + $0x60] sm:$0xff]  ;;  %v64_v30 = vld [vmem:[%s3589_s0 + $0xd0] sm:$0xff]  ;;  %v51_v31 = vld [vmem:[%s3589_s0 + $0x68] sm:$0xff] }
   0xb   :  { %2492 = vmatprep.mubr.msk.f32.mxu1 %vm78_vm0, %v58_v12  ;;  %2737 = vmatpush3.bf16.msra.mxu1 %v2734_v18  ;;  %v65_v32 = vld [vmem:[%s3589_s0 + $0xd8] sm:$0xff]  ;;  %v52_v33 = vld [vmem:[%s3589_s0 + $0x70] sm:$0xff]  ;;  %v66_v34 = vld [vmem:[%s3589_s0 + $0xe0] sm:$0xff] }
   0xc   :  { %2469 = vmatmul.mubr.msk.f32.gmra.mrb[4].mxu0 %vm78_vm0, %v43_v9  ;;  %2739 = vmatprep.subr.bf16.mxu1 %v2738_v22  ;;  %v53_v35 = vld [vmem:[%s3589_s0 + $0x78] sm:$0xff]  ;;  %v67_v36 = vld [vmem:[%s3589_s0 + $0xe8] sm:$0xff]  ;;  %v68_v37 = vld [vmem:[%s3589_s0 + $0xf0] sm:$0xff] }
   0xd   :  { %2471 = vmatprep.mubr.msk.f32.mxu0 %vm78_vm0, %v44_v11  ;;  %v69_v38 = vld [vmem:[%s3589_s0 + $0xf8] sm:$0xff]  ;;  %v797_v39 = vld [vmem:[%s3591_s5] sm:$0xff]  ;;  %v798_v40 = vld [vmem:[%s3591_s5 + $0x8] sm:$0xff] }
   0xe   :  { %2493 = vmatmul.mubr.msk.f32.gmra.mrb[4].mxu1 %vm78_vm0, %v59_v17  ;;  %v799_v41 = vld [vmem:[%s3591_s5 + $0x10] sm:$0xff]  ;;  %v2742_v42 = vpack.c.bf16 %v798_v40, %v797_v39  ;;  %v800_v43 = vld [vmem:[%s3591_s5 + $0x18] sm:$0xff]  ;;  %v3114_v45 = vld [vmem:[%s3592_s2] ss:$0 sm:$0xff] }
   0xf   :  { %2495 = vmatprep.mubr.msk.f32.mxu1 %vm78_vm0, %v60_v21  ;;  %2741 = vmatpush3.bf16.msra.mxu1 %v2738_v22  ;;  %v2746_v44 = vpack.c.bf16 %v800_v43, %v799_v41 }
  0x10   :  { %2472 = vmatmul.mubr.msk.f32.gmra.mrb[6].mxu0 %vm78_vm0, %v45_v16  ;;  %2743 = vmatprep.subr.bf16.mxu0 %v2742_v42 }
  0x11   :  { %2474 = vmatprep.mubr.msk.f32.mxu0 %vm78_vm0, %v46_v20  ;;  %2745 = vmatpush3.bf16.msra.mxu0 %v2742_v42 }
  0x12   :  { %2496 = vmatmul.mubr.msk.f32.gmra.mrb[6].mxu1 %vm78_vm0, %v61_v24  ;;  %2747 = vmatprep.subr.bf16.mxu0 %v2746_v44 }
  0x13   :  { %2498 = vmatprep.mubr.msk.f32.mxu1 %vm78_vm0, %v62_v26 }
  0x14   :  { %2475 = vmatmul.mubr.msk.f32.gmra.mrb[8].mxu0 %vm78_vm0, %v47_v23 }
  0x15   :  { %2477 = vmatprep.mubr.msk.f32.mxu0 %vm78_vm0, %v48_v25  ;;  %2749 = vmatpush3.bf16.msra.mxu0 %v2746_v44 }
  0x16   :  { %2499 = vmatmul.mubr.msk.f32.gmra.mrb[8].mxu1 %vm78_vm0, %v63_v28 }
  0x17   :  { %2501 = vmatprep.mubr.msk.f32.mxu1 %vm78_vm0, %v64_v30 }
  0x18   :  { %2478 = vmatmul.mubr.msk.f32.gmra.mrb[10].mxu0 %vm78_vm0, %v49_v27 }
  0x19   :  { %2480 = vmatprep.mubr.msk.f32.mxu0 %vm78_vm0, %v50_v29 }
  0x1a   :  { %2502 = vmatmul.mubr.msk.f32.gmra.mrb[10].mxu1 %vm78_vm0, %v65_v32 }
  0x1b   :  { %2504 = vmatprep.mubr.msk.f32.mxu1 %vm78_vm0, %v66_v34 }
  0x1c   :  { %2481 = vmatmul.mubr.msk.f32.gmra.mrb[12].mxu0 %vm78_vm0, %v51_v31 }
  0x1d   :  { %2483 = vmatprep.mubr.msk.f32.mxu0 %vm78_vm0, %v52_v33 }
  0x1e   :  { %2505 = vmatmul.mubr.msk.f32.gmra.mrb[12].mxu1 %vm78_vm0, %v67_v36 }
  0x1f   :  { %2507 = vmatprep.mubr.msk.f32.mxu1 %vm78_vm0, %v68_v37 }
  0x20   :  { %2484 = vmatmul.mubr.msk.f32.gmra.mrb[14].mxu0 %vm78_vm0, %v53_v35 }
  0x22   :  { %2508 = vmatmul.mubr.msk.f32.gmra.mrb[14].mxu1 %vm78_vm0, %v69_v38 }
  0xd7   :  { %v2464_v46 = vpop.f32.mrb[0].mxu0 }
  0xd8   :  { %v247_v47 = vadd.f32 %v2464_v46, %v3114_v45  ;;  %v241_v48 = vpop.f32.mrb[1].mxu0 }
  0xd9   :  { %v242_v49 = vadd.f32 %v3114_v45, %v241_v48  ;;  %v3118_v52 = vpop.f32.mrb[0].mxu1 }
  0xda   :  { %v401_v53 = vmax.f32 %v247_v47, 0.0  ;;  %v321_v56 = vpop.f32.mrb[1].mxu1 }
  0xdb   :  { %v400_v50 = vmax.f32 %v242_v49, 0.0  ;;  %v2467_v51 = vpop.f32.mrb[2].mxu0  ;;  %v322_v36 = vadd.f32 %v3114_v45, %v321_v56  ;;  %v327_v49 = vadd.f32 %v3118_v52, %v3114_v45 }
  0xdc   :  { %v257_v54 = vadd.f32 %v2467_v51, %v3114_v45  ;;  %v251_v55 = vpop.f32.mrb[3].mxu0 }
  0xdd   :  { %v252_v57 = vadd.f32 %v3114_v45, %v251_v55  ;;  %2518 = vmatprep.mubr.msk.f32.mxu1 %vm443_vm1, %v400_v50  ;;  %v3124_v60 = vpop.f32.mrb[2].mxu1  ;;  %v416_v44 = vmax.f32 %v322_v36, 0.0 }
  0xde   :  { %2519 = vmatmul.mubr.msk.f32.vlgmr.msra.gmra.mrb[16].mxu1 %vm443_vm1, %v401_v53  ;;  %v403_v61 = vmax.f32 %v257_v54, 0.0  ;;  %v331_v0 = vpop.f32.mrb[3].mxu1  ;;  %v417_v54 = vmax.f32 %v327_v49, 0.0  ;;  %v337_v55 = vadd.f32 %v3124_v60, %v3114_v45 }
  0xdf   :  { %v402_v58 = vmax.f32 %v252_v57, 0.0  ;;  %v2470_v59 = vpop.f32.mrb[4].mxu0  ;;  %v332_v46 = vadd.f32 %v3114_v45, %v331_v0 }
  0xe0   :  { %v267_v62 = vadd.f32 %v2470_v59, %v3114_v45  ;;  %v261_v63 = vpop.f32.mrb[5].mxu0  ;;  %v419_v57 = vmax.f32 %v337_v55, 0.0 }
  0xe1   :  { %v262_v1 = vadd.f32 %v3114_v45, %v261_v63  ;;  %2521 = vmatprep.mubr.msk.f32.mxu1 %vm443_vm1, %v402_v58  ;;  %v3130_v4 = vpop.f32.mrb[4].mxu1  ;;  %v418_v51 = vmax.f32 %v332_v46, 0.0 }
  0xe2   :  { %2522 = vmatmul.mubr.msk.f32.gmra.mrb[18].mxu1 %vm443_vm1, %v403_v61  ;;  %v405_v5 = vmax.f32 %v267_v62, 0.0  ;;  %v341_v8 = vpop.f32.mrb[5].mxu1  ;;  %v347_v58 = vadd.f32 %v3130_v4, %v3114_v45 }
  0xe3   :  { %v404_v2 = vmax.f32 %v262_v1, 0.0  ;;  %v2473_v3 = vpop.f32.mrb[6].mxu0  ;;  %v342_v53 = vadd.f32 %v3114_v45, %v341_v8 }
  0xe4   :  { %v277_v6 = vadd.f32 %v2473_v3, %v3114_v45  ;;  %v271_v7 = vpop.f32.mrb[7].mxu0  ;;  %v421_v62 = vmax.f32 %v347_v58, 0.0 }
  0xe5   :  { %v272_v9 = vadd.f32 %v3114_v45, %v271_v7  ;;  %2524 = vmatprep.mubr.msk.f32.mxu1 %vm443_vm1, %v404_v2  ;;  %v3136_v12 = vpop.f32.mrb[6].mxu1  ;;  %v420_v56 = vmax.f32 %v342_v53, 0.0 }
  0xe6   :  { %2525 = vmatmul.mubr.msk.f32.gmra.mrb[20].mxu1 %vm443_vm1, %v405_v5  ;;  %v407_v13 = vmax.f32 %v277_v6, 0.0  ;;  %v351_v16 = vpop.f32.mrb[7].mxu1  ;;  %v357_v60 = vadd.f32 %v3136_v12, %v3114_v45 }
  0xe7   :  { %v406_v10 = vmax.f32 %v272_v9, 0.0  ;;  %v2476_v11 = vpop.f32.mrb[8].mxu0  ;;  %v352_v52 = vadd.f32 %v3114_v45, %v351_v16  ;;  %v1162_v16 = vld [vmem:[%s3593_s7 + $0x8] sm:$0xff] }
  0xe8   :  { %v287_v14 = vadd.f32 %v2476_v11, %v3114_v45  ;;  %v281_v15 = vpop.f32.mrb[9].mxu0  ;;  %v423_v1 = vmax.f32 %v357_v60, 0.0 }
  0xe9   :  { %v282_v17 = vadd.f32 %v3114_v45, %v281_v15  ;;  %2527 = vmatprep.mubr.msk.f32.mxu1 %vm443_vm1, %v406_v10  ;;  %v2500_v20 = vpop.f32.mrb[8].mxu1  ;;  %v422_v59 = vmax.f32 %v352_v52, 0.0  ;;  %v1161_v15 = vld [vmem:[%s3593_s7] sm:$0xff] }
  0xea   :  { %2528 = vmatmul.mubr.msk.f32.gmra.mrb[22].mxu1 %vm443_vm1, %v407_v13  ;;  %v409_v21 = vmax.f32 %v287_v14, 0.0  ;;  %v361_v24 = vpop.f32.mrb[9].mxu1  ;;  %v367_v2 = vadd.f32 %v2500_v20, %v3114_v45  ;;  %v3207_v20 = vld [vmem:[%s3594_s4] ss:$0 sm:$0xff] }
  0xeb   :  { %v408_v18 = vmax.f32 %v282_v17, 0.0  ;;  %v2479_v19 = vpop.f32.mrb[10].mxu0  ;;  %v362_v61 = vadd.f32 %v3114_v45, %v361_v24  ;;  %v1163_v17 = vld [vmem:[%s3593_s7 + $0x10] sm:$0xff] }
  0xec   :  { %v297_v22 = vadd.f32 %v2479_v19, %v3114_v45  ;;  %v291_v23 = vpop.f32.mrb[11].mxu0  ;;  %v425_v5 = vmax.f32 %v367_v2, 0.0 }
  0xed   :  { %v292_v25 = vadd.f32 %v3114_v45, %v291_v23  ;;  %2530 = vmatprep.mubr.msk.f32.mxu1 %vm443_vm1, %v408_v18  ;;  %v2503_v28 = vpop.f32.mrb[10].mxu1  ;;  %v424_v63 = vmax.f32 %v362_v61, 0.0  ;;  %v1164_v18 = vld [vmem:[%s3593_s7 + $0x18] sm:$0xff] }
  0xee   :  { %2531 = vmatmul.mubr.msk.f32.gmra.mrb[24].mxu1 %vm443_vm1, %v409_v21  ;;  %v411_v29 = vmax.f32 %v297_v22, 0.0  ;;  %v371_v32 = vpop.f32.mrb[11].mxu1  ;;  %v377_v6 = vadd.f32 %v2503_v28, %v3114_v45  ;;  %v2754_v19 = vpack.c.bf16 %v1164_v18, %v1163_v17 }
  0xef   :  { %v410_v26 = vmax.f32 %v292_v25, 0.0  ;;  %v2482_v27 = vpop.f32.mrb[12].mxu0  ;;  %v372_v0 = vadd.f32 %v3114_v45, %v371_v32 }
  0xf0   :  { %v307_v30 = vadd.f32 %v2482_v27, %v3114_v45  ;;  %v301_v31 = vpop.f32.mrb[13].mxu0  ;;  %v427_v9 = vmax.f32 %v377_v6, 0.0 }
  0xf1   :  { %v302_v33 = vadd.f32 %v3114_v45, %v301_v31  ;;  %2533 = vmatprep.mubr.msk.f32.mxu1 %vm443_vm1, %v410_v26  ;;  %v2506_v37 = vpop.f32.mrb[12].mxu1  ;;  %v426_v3 = vmax.f32 %v372_v0, 0.0 }
  0xf2   :  { %2534 = vmatmul.mubr.msk.f32.gmra.mrb[26].mxu1 %vm443_vm1, %v411_v29  ;;  %v413_v38 = vmax.f32 %v307_v30, 0.0  ;;  %v381_v41 = vpop.f32.mrb[13].mxu1  ;;  %v387_v10 = vadd.f32 %v2506_v37, %v3114_v45 }
  0xf3   :  { %v412_v34 = vmax.f32 %v302_v33, 0.0  ;;  %v2485_v35 = vpop.f32.mrb[14].mxu0  ;;  %v382_v4 = vadd.f32 %v3114_v45, %v381_v41 }
  0xf4   :  { %v317_v39 = vadd.f32 %v2485_v35, %v3114_v45  ;;  %v311_v40 = vpop.f32.mrb[15].mxu0  ;;  %v429_v12 = vmax.f32 %v387_v10, 0.0 }
  0xf5   :  { %v312_v42 = vadd.f32 %v3114_v45, %v311_v40  ;;  %2536 = vmatprep.mubr.msk.f32.mxu1 %vm443_vm1, %v412_v34  ;;  %v2509_v47 = vpop.f32.mrb[14].mxu1  ;;  %v428_v7 = vmax.f32 %v382_v4, 0.0 }
  0xf6   :  { %2537 = vmatmul.mubr.msk.f32.gmra.mrb[28].mxu1 %vm443_vm1, %v413_v38  ;;  %v415_v48 = vmax.f32 %v317_v39, 0.0  ;;  %v391_v50 = vpop.f32.mrb[15].mxu1  ;;  %v397_v13 = vadd.f32 %v2509_v47, %v3114_v45 }
  0xf7   :  { %v414_v43 = vmax.f32 %v312_v42, 0.0  ;;  %v392_v8 = vadd.f32 %v3114_v45, %v391_v50  ;;  %v2750_v45 = vpack.c.bf16 %v1162_v16, %v1161_v15 }
  0xf8   :  { %v431_v14 = vmax.f32 %v397_v13, 0.0 }
  0xf9   :  { %2539 = vmatprep.mubr.msk.f32.mxu1 %vm443_vm1, %v414_v43  ;;  %v430_v11 = vmax.f32 %v392_v8, 0.0  ;;  %2751 = vmatprep.subr.bf16.mxu1 %v2750_v45 }
  0xfa   :  { %2540 = vmatmul.mubr.msk.f32.gmra.mrb[30].mxu1 %vm443_vm1, %v415_v48 }
  0xfb   :  { %2542 = vmatprep.mubr.msk.f32.mxu1 %vm443_vm1, %v416_v44  ;;  %2753 = vmatpush3.bf16.msra.mxu1 %v2750_v45 }
  0xfc   :  { %2755 = vmatprep.subr.bf16.mxu1 %v2754_v19 }
  0xfe   :  { %2543 = vmatmul.mubr.msk.f32.gmra.mrb[32].mxu1 %vm443_vm1, %v417_v54 }
  0xff   :  { %2545 = vmatprep.mubr.msk.f32.mxu1 %vm443_vm1, %v418_v51  ;;  %2757 = vmatpush3.bf16.msra.mxu1 %v2754_v19 }
 0x102   :  { %2546 = vmatmul.mubr.msk.f32.gmra.mrb[34].mxu1 %vm443_vm1, %v419_v57 }
 0x103   :  { %2548 = vmatprep.mubr.msk.f32.mxu1 %vm443_vm1, %v420_v56 }
 0x106   :  { %2549 = vmatmul.mubr.msk.f32.gmra.mrb[36].mxu1 %vm443_vm1, %v421_v62 }
 0x107   :  { %2551 = vmatprep.mubr.msk.f32.mxu1 %vm443_vm1, %v422_v59 }
 0x10a   :  { %2552 = vmatmul.mubr.msk.f32.gmra.mrb[38].mxu1 %vm443_vm1, %v423_v1 }
 0x10b   :  { %2554 = vmatprep.mubr.msk.f32.mxu1 %vm443_vm1, %v424_v63 }
 0x10e   :  { %2555 = vmatmul.mubr.msk.f32.gmra.mrb[40].mxu1 %vm443_vm1, %v425_v5 }
 0x10f   :  { %2557 = vmatprep.mubr.msk.f32.mxu1 %vm443_vm1, %v426_v3 }
 0x112   :  { %2558 = vmatmul.mubr.msk.f32.gmra.mrb[42].mxu1 %vm443_vm1, %v427_v9 }
 0x113   :  { %2560 = vmatprep.mubr.msk.f32.mxu1 %vm443_vm1, %v428_v7 }
 0x116   :  { %2561 = vmatmul.mubr.msk.f32.gmra.mrb[44].mxu1 %vm443_vm1, %v429_v12 }
 0x117   :  { %2563 = vmatprep.mubr.msk.f32.mxu1 %vm443_vm1, %v430_v11 }
 0x11a   :  { %2564 = vmatmul.mubr.msk.f32.gmra.mrb[46].mxu1 %vm443_vm1, %v431_v14 }
 0x1b1   :  { %v2520_v21 = vpop.f32.mrb[16].mxu1 }
 0x1b2   :  { %v612_v22 = vadd.f32 %v2520_v21, %v3207_v20  ;;  %v606_v23 = vpop.f32.mrb[17].mxu1 }
 0x1b3   :  { %v607_v24 = vadd.f32 %v3207_v20, %v606_v23 }
 0x1b4   :  { %v766_v27 = vmax.f32 %v612_v22, 0.0 }
 0x1b5   :  { %v765_v25 = vmax.f32 %v607_v24, 0.0  ;;  %v2523_v26 = vpop.f32.mrb[18].mxu1 }
 0x1b6   :  { %v622_v28 = vadd.f32 %v2523_v26, %v3207_v20  ;;  %v616_v29 = vpop.f32.mrb[19].mxu1 }
 0x1b7   :  { %v617_v30 = vadd.f32 %v3207_v20, %v616_v29  ;;  %2574 = vmatprep.mubr.msk.f32.mxu0 %vm443_vm1, %v765_v25 }
 0x1b8   :  { %2575 = vmatmul.mubr.msk.f32.vlgmr.msra.gmra.mrb[16].mxu0 %vm443_vm1, %v766_v27  ;;  %v768_v33 = vmax.f32 %v622_v28, 0.0 }
 0x1b9   :  { %v767_v31 = vmax.f32 %v617_v30, 0.0  ;;  %v2526_v32 = vpop.f32.mrb[20].mxu1 }
 0x1ba   :  { %v632_v34 = vadd.f32 %v2526_v32, %v3207_v20  ;;  %v626_v35 = vpop.f32.mrb[21].mxu1 }
 0x1bb   :  { %v627_v36 = vadd.f32 %v3207_v20, %v626_v35  ;;  %2577 = vmatprep.mubr.msk.f32.mxu0 %vm443_vm1, %v767_v31 }
 0x1bc   :  { %2578 = vmatmul.mubr.msk.f32.gmra.mrb[18].mxu0 %vm443_vm1, %v768_v33  ;;  %v770_v39 = vmax.f32 %v632_v34, 0.0 }
 0x1bd   :  { %v769_v37 = vmax.f32 %v627_v36, 0.0  ;;  %v2529_v38 = vpop.f32.mrb[22].mxu1 }
 0x1be   :  { %v642_v40 = vadd.f32 %v2529_v38, %v3207_v20  ;;  %v636_v41 = vpop.f32.mrb[23].mxu1 }
 0x1bf   :  { %v637_v42 = vadd.f32 %v3207_v20, %v636_v41  ;;  %2580 = vmatprep.mubr.msk.f32.mxu0 %vm443_vm1, %v769_v37 }
 0x1c0   :  { %2581 = vmatmul.mubr.msk.f32.gmra.mrb[20].mxu0 %vm443_vm1, %v770_v39  ;;  %v772_v46 = vmax.f32 %v642_v40, 0.0 }
 0x1c1   :  { %v771_v43 = vmax.f32 %v637_v42, 0.0  ;;  %v2532_v44 = vpop.f32.mrb[24].mxu1 }
 0x1c2   :  { %v652_v47 = vadd.f32 %v2532_v44, %v3207_v20  ;;  %v646_v48 = vpop.f32.mrb[25].mxu1 }
 0x1c3   :  { %v647_v49 = vadd.f32 %v3207_v20, %v646_v48  ;;  %2583 = vmatprep.mubr.msk.f32.mxu0 %vm443_vm1, %v771_v43 }
 0x1c4   :  { %2584 = vmatmul.mubr.msk.f32.gmra.mrb[22].mxu0 %vm443_vm1, %v772_v46  ;;  %v774_v53 = vmax.f32 %v652_v47, 0.0 }
 0x1c5   :  { %v773_v50 = vmax.f32 %v647_v49, 0.0  ;;  %v2535_v51 = vpop.f32.mrb[26].mxu1 }
 0x1c6   :  { %v662_v54 = vadd.f32 %v2535_v51, %v3207_v20  ;;  %v656_v55 = vpop.f32.mrb[27].mxu1 }
 0x1c7   :  { %v657_v56 = vadd.f32 %v3207_v20, %v656_v55  ;;  %2586 = vmatprep.mubr.msk.f32.mxu0 %vm443_vm1, %v773_v50 }
 0x1c8   :  { %2587 = vmatmul.mubr.msk.f32.gmra.mrb[24].mxu0 %vm443_vm1, %v774_v53  ;;  %v776_v58 = vmax.f32 %v662_v54, 0.0 }
 0x1c9   :  { %v775_v52 = vmax.f32 %v657_v56, 0.0  ;;  %v2538_v57 = vpop.f32.mrb[28].mxu1  ;;  %v1525_v56 = vld [vmem:[%s3595_s9] sm:$0xff] }
 0x1ca   :  { %v672_v59 = vadd.f32 %v2538_v57, %v3207_v20  ;;  %v666_v61 = vpop.f32.mrb[29].mxu1 }
 0x1cb   :  { %v667_v62 = vadd.f32 %v3207_v20, %v666_v61  ;;  %2589 = vmatprep.mubr.msk.f32.mxu0 %vm443_vm1, %v775_v52  ;;  %v1526_v52 = vld [vmem:[%s3595_s9 + $0x8] sm:$0xff]  ;;  %v3288_v61 = vld [vmem:[%s3596_s6] ss:$0 sm:$0xff] }
 0x1cc   :  { %2590 = vmatmul.mubr.msk.f32.gmra.mrb[26].mxu0 %vm443_vm1, %v776_v58  ;;  %v778_v0 = vmax.f32 %v672_v59, 0.0  ;;  %v2758_v57 = vpack.c.bf16 %v1526_v52, %v1525_v56  ;;  %v1528_v58 = vld [vmem:[%s3595_s9 + $0x18] sm:$0xff] }
 0x1cd   :  { %v777_v60 = vmax.f32 %v667_v62, 0.0  ;;  %v2541_v63 = vpop.f32.mrb[30].mxu1 }
 0x1ce   :  { %v682_v1 = vadd.f32 %v2541_v63, %v3207_v20  ;;  %v676_v2 = vpop.f32.mrb[31].mxu1  ;;  %2759 = vmatprep.subr.bf16.mxu0 %v2758_v57 }
 0x1cf   :  { %v677_v3 = vadd.f32 %v3207_v20, %v676_v2  ;;  %2592 = vmatprep.mubr.msk.f32.mxu0 %vm443_vm1, %v777_v60  ;;  %2761 = vmatpush3.bf16.msra.mxu0 %v2758_v57 }
 0x1d0   :  { %2593 = vmatmul.mubr.msk.f32.gmra.mrb[28].mxu0 %vm443_vm1, %v778_v0  ;;  %v780_v6 = vmax.f32 %v682_v1, 0.0 }
 0x1d1   :  { %v779_v4 = vmax.f32 %v677_v3, 0.0  ;;  %v2544_v5 = vpop.f32.mrb[32].mxu1 }
 0x1d2   :  { %v692_v7 = vadd.f32 %v2544_v5, %v3207_v20  ;;  %v686_v8 = vpop.f32.mrb[33].mxu1 }
 0x1d3   :  { %v687_v9 = vadd.f32 %v3207_v20, %v686_v8  ;;  %2595 = vmatprep.mubr.msk.f32.mxu0 %vm443_vm1, %v779_v4 }
 0x1d4   :  { %2596 = vmatmul.mubr.msk.f32.gmra.mrb[30].mxu0 %vm443_vm1, %v780_v6  ;;  %v782_v12 = vmax.f32 %v692_v7, 0.0 }
 0x1d5   :  { %v781_v10 = vmax.f32 %v687_v9, 0.0  ;;  %v2547_v11 = vpop.f32.mrb[34].mxu1 }
 0x1d6   :  { %v702_v13 = vadd.f32 %v2547_v11, %v3207_v20  ;;  %v696_v14 = vpop.f32.mrb[35].mxu1 }
 0x1d7   :  { %v697_v15 = vadd.f32 %v3207_v20, %v696_v14  ;;  %2598 = vmatprep.mubr.msk.f32.mxu0 %vm443_vm1, %v781_v10 }
 0x1d8   :  { %2599 = vmatmul.mubr.msk.f32.gmra.mrb[32].mxu0 %vm443_vm1, %v782_v12  ;;  %v784_v45 = vmax.f32 %v702_v13, 0.0 }
 0x1d9   :  { %v783_v16 = vmax.f32 %v697_v15, 0.0  ;;  %v2550_v17 = vpop.f32.mrb[36].mxu1 }
 0x1da   :  { %v712_v18 = vadd.f32 %v2550_v17, %v3207_v20  ;;  %v706_v19 = vpop.f32.mrb[37].mxu1 }
 0x1db   :  { %v707_v21 = vadd.f32 %v3207_v20, %v706_v19  ;;  %2601 = vmatprep.mubr.msk.f32.mxu0 %vm443_vm1, %v783_v16 }
 0x1dc   :  { %2602 = vmatmul.mubr.msk.f32.gmra.mrb[34].mxu0 %vm443_vm1, %v784_v45  ;;  %v786_v24 = vmax.f32 %v712_v18, 0.0 }
 0x1dd   :  { %v785_v22 = vmax.f32 %v707_v21, 0.0  ;;  %v2553_v23 = vpop.f32.mrb[38].mxu1 }
 0x1de   :  { %v722_v25 = vadd.f32 %v2553_v23, %v3207_v20  ;;  %v716_v26 = vpop.f32.mrb[39].mxu1 }
 0x1df   :  { %v717_v27 = vadd.f32 %v3207_v20, %v716_v26  ;;  %2604 = vmatprep.mubr.msk.f32.mxu0 %vm443_vm1, %v785_v22 }
 0x1e0   :  { %2605 = vmatmul.mubr.msk.f32.gmra.mrb[36].mxu0 %vm443_vm1, %v786_v24  ;;  %v788_v30 = vmax.f32 %v722_v25, 0.0 }
 0x1e1   :  { %v787_v28 = vmax.f32 %v717_v27, 0.0  ;;  %v2556_v29 = vpop.f32.mrb[40].mxu1 }
 0x1e2   :  { %v732_v31 = vadd.f32 %v2556_v29, %v3207_v20  ;;  %v726_v32 = vpop.f32.mrb[41].mxu1 }
 0x1e3   :  { %v727_v33 = vadd.f32 %v3207_v20, %v726_v32  ;;  %2607 = vmatprep.mubr.msk.f32.mxu0 %vm443_vm1, %v787_v28 }
 0x1e4   :  { %2608 = vmatmul.mubr.msk.f32.gmra.mrb[38].mxu0 %vm443_vm1, %v788_v30  ;;  %v790_v36 = vmax.f32 %v732_v31, 0.0 }
 0x1e5   :  { %v789_v34 = vmax.f32 %v727_v33, 0.0  ;;  %v2559_v35 = vpop.f32.mrb[42].mxu1 }
 0x1e6   :  { %v742_v37 = vadd.f32 %v2559_v35, %v3207_v20  ;;  %v736_v38 = vpop.f32.mrb[43].mxu1 }
 0x1e7   :  { %v737_v39 = vadd.f32 %v3207_v20, %v736_v38  ;;  %2610 = vmatprep.mubr.msk.f32.mxu0 %vm443_vm1, %v789_v34 }
 0x1e8   :  { %2611 = vmatmul.mubr.msk.f32.gmra.mrb[40].mxu0 %vm443_vm1, %v790_v36  ;;  %v792_v42 = vmax.f32 %v742_v37, 0.0 }
 0x1e9   :  { %v791_v40 = vmax.f32 %v737_v39, 0.0  ;;  %v2562_v41 = vpop.f32.mrb[44].mxu1 }
 0x1ea   :  { %v752_v43 = vadd.f32 %v2562_v41, %v3207_v20  ;;  %v746_v44 = vpop.f32.mrb[45].mxu1 }
 0x1eb   :  { %v747_v46 = vadd.f32 %v3207_v20, %v746_v44  ;;  %2613 = vmatprep.mubr.msk.f32.mxu0 %vm443_vm1, %v791_v40 }
 0x1ec   :  { %2614 = vmatmul.mubr.msk.f32.gmra.mrb[42].mxu0 %vm443_vm1, %v792_v42  ;;  %v794_v49 = vmax.f32 %v752_v43, 0.0 }
 0x1ed   :  { %v793_v47 = vmax.f32 %v747_v46, 0.0  ;;  %v2565_v48 = vpop.f32.mrb[46].mxu1 }
 0x1ee   :  { %v762_v50 = vadd.f32 %v2565_v48, %v3207_v20  ;;  %v756_v51 = vpop.f32.mrb[47].mxu1 }
 0x1ef   :  { %v757_v53 = vadd.f32 %v3207_v20, %v756_v51  ;;  %2616 = vmatprep.mubr.msk.f32.mxu0 %vm443_vm1, %v793_v47  ;;  %v1527_v20 = vld [vmem:[%s3595_s9 + $0x10] sm:$0xff] }
 0x1f0   :  { %2617 = vmatmul.mubr.msk.f32.gmra.mrb[44].mxu0 %vm443_vm1, %v794_v49  ;;  %v796_v55 = vmax.f32 %v762_v50, 0.0  ;;  %v2762_v59 = vpack.c.bf16 %v1528_v58, %v1527_v20 }
 0x1f1   :  { %v795_v54 = vmax.f32 %v757_v53, 0.0 }
 0x1f2   :  { %2763 = vmatprep.subr.bf16.mxu0 %v2762_v59 }
 0x1f3   :  { %2619 = vmatprep.mubr.msk.f32.mxu0 %vm443_vm1, %v795_v54  ;;  %2765 = vmatpush3.bf16.msra.mxu0 %v2762_v59 }
 0x1f4   :  { %2620 = vmatmul.mubr.msk.f32.gmra.mrb[46].mxu0 %vm443_vm1, %v796_v55 }
 0x28b   :  { %v2576_v62 = vpop.f32.mrb[16].mxu0 }
 0x28c   :  { %v976_v60 = vadd.f32 %v2576_v62, %v3288_v61  ;;  %v970_v63 = vpop.f32.mrb[17].mxu0 }
 0x28d   :  { %v971_v0 = vadd.f32 %v3288_v61, %v970_v63 }
 0x28e   :  { %v1130_v3 = vmax.f32 %v976_v60, 0.0 }
 0x28f   :  { %v1129_v1 = vmax.f32 %v971_v0, 0.0  ;;  %v2579_v2 = vpop.f32.mrb[18].mxu0 }
 0x290   :  { %v986_v4 = vadd.f32 %v2579_v2, %v3288_v61  ;;  %v980_v5 = vpop.f32.mrb[19].mxu0 }
 0x291   :  { %v981_v6 = vadd.f32 %v3288_v61, %v980_v5  ;;  %2630 = vmatprep.mubr.msk.f32.mxu1 %vm443_vm1, %v1129_v1 }
 0x292   :  { %2631 = vmatmul.mubr.msk.f32.vlgmr.msra.gmra.mrb[48].mxu1 %vm443_vm1, %v1130_v3  ;;  %v1132_v9 = vmax.f32 %v986_v4, 0.0 }
 0x293   :  { %v1131_v7 = vmax.f32 %v981_v6, 0.0  ;;  %v2582_v8 = vpop.f32.mrb[20].mxu0 }
 0x294   :  { %v996_v10 = vadd.f32 %v2582_v8, %v3288_v61  ;;  %v990_v11 = vpop.f32.mrb[21].mxu0 }
 0x295   :  { %v991_v12 = vadd.f32 %v3288_v61, %v990_v11  ;;  %2633 = vmatprep.mubr.msk.f32.mxu1 %vm443_vm1, %v1131_v7 }
 0x296   :  { %2634 = vmatmul.mubr.msk.f32.gmra.mrb[50].mxu1 %vm443_vm1, %v1132_v9  ;;  %v1134_v15 = vmax.f32 %v996_v10, 0.0 }
 0x297   :  { %v1133_v13 = vmax.f32 %v991_v12, 0.0  ;;  %v2585_v14 = vpop.f32.mrb[22].mxu0 }
 0x298   :  { %v1006_v16 = vadd.f32 %v2585_v14, %v3288_v61  ;;  %v1000_v17 = vpop.f32.mrb[23].mxu0 }
 0x299   :  { %v1001_v45 = vadd.f32 %v3288_v61, %v1000_v17  ;;  %2636 = vmatprep.mubr.msk.f32.mxu1 %vm443_vm1, %v1133_v13 }
 0x29a   :  { %2637 = vmatmul.mubr.msk.f32.gmra.mrb[52].mxu1 %vm443_vm1, %v1134_v15  ;;  %v1136_v21 = vmax.f32 %v1006_v16, 0.0 }
 0x29b   :  { %v1135_v18 = vmax.f32 %v1001_v45, 0.0  ;;  %v2588_v19 = vpop.f32.mrb[24].mxu0 }
 0x29c   :  { %v1016_v22 = vadd.f32 %v2588_v19, %v3288_v61  ;;  %v1010_v23 = vpop.f32.mrb[25].mxu0 }
 0x29d   :  { %v1011_v24 = vadd.f32 %v3288_v61, %v1010_v23  ;;  %2639 = vmatprep.mubr.msk.f32.mxu1 %vm443_vm1, %v1135_v18 }
 0x29e   :  { %2640 = vmatmul.mubr.msk.f32.gmra.mrb[54].mxu1 %vm443_vm1, %v1136_v21  ;;  %v1138_v27 = vmax.f32 %v1016_v22, 0.0 }
 0x29f   :  { %v1137_v25 = vmax.f32 %v1011_v24, 0.0  ;;  %v2591_v26 = vpop.f32.mrb[26].mxu0 }
 0x2a0   :  { %v1026_v28 = vadd.f32 %v2591_v26, %v3288_v61  ;;  %v1020_v29 = vpop.f32.mrb[27].mxu0 }
 0x2a1   :  { %v1021_v30 = vadd.f32 %v3288_v61, %v1020_v29  ;;  %2642 = vmatprep.mubr.msk.f32.mxu1 %vm443_vm1, %v1137_v25 }
 0x2a2   :  { %2643 = vmatmul.mubr.msk.f32.gmra.mrb[56].mxu1 %vm443_vm1, %v1138_v27  ;;  %v1140_v33 = vmax.f32 %v1026_v28, 0.0 }
 0x2a3   :  { %v1139_v31 = vmax.f32 %v1021_v30, 0.0  ;;  %v2594_v32 = vpop.f32.mrb[28].mxu0  ;;  %v3357_v30 = vld [vmem:[%s3597_s8] ss:$0 sm:$0xff] }
 0x2a4   :  { %v1036_v34 = vadd.f32 %v2594_v32, %v3288_v61  ;;  %v1030_v35 = vpop.f32.mrb[29].mxu0 }
 0x2a5   :  { %v1031_v36 = vadd.f32 %v3288_v61, %v1030_v35  ;;  %2645 = vmatprep.mubr.msk.f32.mxu1 %vm443_vm1, %v1139_v31 }
 0x2a6   :  { %2646 = vmatmul.mubr.msk.f32.gmra.mrb[58].mxu1 %vm443_vm1, %v1140_v33  ;;  %v1142_v39 = vmax.f32 %v1036_v34, 0.0 }
 0x2a7   :  { %v1141_v37 = vmax.f32 %v1031_v36, 0.0  ;;  %v2597_v38 = vpop.f32.mrb[30].mxu0 }
 0x2a8   :  { %v1046_v40 = vadd.f32 %v2597_v38, %v3288_v61  ;;  %v1040_v41 = vpop.f32.mrb[31].mxu0 }
 0x2a9   :  { %v1041_v42 = vadd.f32 %v3288_v61, %v1040_v41  ;;  %2648 = vmatprep.mubr.msk.f32.mxu1 %vm443_vm1, %v1141_v37 }
 0x2aa   :  { %2649 = vmatmul.mubr.msk.f32.gmra.mrb[60].mxu1 %vm443_vm1, %v1142_v39  ;;  %v1144_v46 = vmax.f32 %v1046_v40, 0.0 }
 0x2ab   :  { %v1143_v43 = vmax.f32 %v1041_v42, 0.0  ;;  %v2600_v44 = vpop.f32.mrb[32].mxu0 }
 0x2ac   :  { %v1056_v47 = vadd.f32 %v2600_v44, %v3288_v61  ;;  %v1050_v48 = vpop.f32.mrb[33].mxu0 }
 0x2ad   :  { %v1051_v49 = vadd.f32 %v3288_v61, %v1050_v48  ;;  %2651 = vmatprep.mubr.msk.f32.mxu1 %vm443_vm1, %v1143_v43 }
 0x2ae   :  { %2652 = vmatmul.mubr.msk.f32.gmra.mrb[62].mxu1 %vm443_vm1, %v1144_v46  ;;  %v1146_v53 = vmax.f32 %v1056_v47, 0.0 }
 0x2af   :  { %v1145_v50 = vmax.f32 %v1051_v49, 0.0  ;;  %v2603_v51 = vpop.f32.mrb[34].mxu0 }
 0x2b0   :  { %v1066_v54 = vadd.f32 %v2603_v51, %v3288_v61  ;;  %v1060_v55 = vpop.f32.mrb[35].mxu0 }
 0x2b1   :  { %v1061_v56 = vadd.f32 %v3288_v61, %v1060_v55  ;;  %2654 = vmatprep.mubr.msk.f32.mxu1 %vm443_vm1, %v1145_v50 }
 0x2b2   :  { %2655 = vmatmul.mubr.msk.f32.gmra.mrb[64].mxu1 %vm443_vm1, %v1146_v53  ;;  %v1148_v57 = vmax.f32 %v1066_v54, 0.0 }
 0x2b3   :  { %v1147_v52 = vmax.f32 %v1061_v56, 0.0  ;;  %v2606_v20 = vpop.f32.mrb[36].mxu0 }
 0x2b4   :  { %v1076_v58 = vadd.f32 %v2606_v20, %v3288_v61  ;;  %v1070_v59 = vpop.f32.mrb[37].mxu0 }
 0x2b5   :  { %v1071_v62 = vadd.f32 %v3288_v61, %v1070_v59  ;;  %2657 = vmatprep.mubr.msk.f32.mxu1 %vm443_vm1, %v1147_v52 }
 0x2b6   :  { %2658 = vmatmul.mubr.msk.f32.gmra.mrb[66].mxu1 %vm443_vm1, %v1148_v57  ;;  %v1150_v0 = vmax.f32 %v1076_v58, 0.0 }
 0x2b7   :  { %v1149_v60 = vmax.f32 %v1071_v62, 0.0  ;;  %v2609_v63 = vpop.f32.mrb[38].mxu0 }
 0x2b8   :  { %v1086_v1 = vadd.f32 %v2609_v63, %v3288_v61  ;;  %v1080_v2 = vpop.f32.mrb[39].mxu0 }
 0x2b9   :  { %v1081_v3 = vadd.f32 %v3288_v61, %v1080_v2  ;;  %2660 = vmatprep.mubr.msk.f32.mxu1 %vm443_vm1, %v1149_v60 }
 0x2ba   :  { %2661 = vmatmul.mubr.msk.f32.gmra.mrb[68].mxu1 %vm443_vm1, %v1150_v0  ;;  %v1152_v6 = vmax.f32 %v1086_v1, 0.0 }
 0x2bb   :  { %v1151_v4 = vmax.f32 %v1081_v3, 0.0  ;;  %v2612_v5 = vpop.f32.mrb[40].mxu0 }
 0x2bc   :  { %v1096_v7 = vadd.f32 %v2612_v5, %v3288_v61  ;;  %v1090_v8 = vpop.f32.mrb[41].mxu0 }
 0x2bd   :  { %v1091_v9 = vadd.f32 %v3288_v61, %v1090_v8  ;;  %2663 = vmatprep.mubr.msk.f32.mxu1 %vm443_vm1, %v1151_v4 }
 0x2be   :  { %2664 = vmatmul.mubr.msk.f32.gmra.mrb[70].mxu1 %vm443_vm1, %v1152_v6  ;;  %v1154_v12 = vmax.f32 %v1096_v7, 0.0 }
 0x2bf   :  { %v1153_v10 = vmax.f32 %v1091_v9, 0.0  ;;  %v2615_v11 = vpop.f32.mrb[42].mxu0 }
 0x2c0   :  { %v1106_v13 = vadd.f32 %v2615_v11, %v3288_v61  ;;  %v1100_v14 = vpop.f32.mrb[43].mxu0 }
 0x2c1   :  { %v1101_v15 = vadd.f32 %v3288_v61, %v1100_v14  ;;  %2666 = vmatprep.mubr.msk.f32.mxu1 %vm443_vm1, %v1153_v10 }
 0x2c2   :  { %2667 = vmatmul.mubr.msk.f32.gmra.mrb[72].mxu1 %vm443_vm1, %v1154_v12  ;;  %v1156_v45 = vmax.f32 %v1106_v13, 0.0 }
 0x2c3   :  { %v1155_v16 = vmax.f32 %v1101_v15, 0.0  ;;  %v2618_v17 = vpop.f32.mrb[44].mxu0 }
 0x2c4   :  { %v1116_v18 = vadd.f32 %v2618_v17, %v3288_v61  ;;  %v1110_v19 = vpop.f32.mrb[45].mxu0 }
 0x2c5   :  { %v1111_v21 = vadd.f32 %v3288_v61, %v1110_v19  ;;  %2669 = vmatprep.mubr.msk.f32.mxu1 %vm443_vm1, %v1155_v16 }
 0x2c6   :  { %2670 = vmatmul.mubr.msk.f32.gmra.mrb[74].mxu1 %vm443_vm1, %v1156_v45  ;;  %v1158_v24 = vmax.f32 %v1116_v18, 0.0 }
 0x2c7   :  { %v1157_v22 = vmax.f32 %v1111_v21, 0.0  ;;  %v2621_v23 = vpop.f32.mrb[46].mxu0 }
 0x2c8   :  { %v1126_v25 = vadd.f32 %v2621_v23, %v3288_v61  ;;  %v1120_v26 = vpop.f32.mrb[47].mxu0 }
 0x2c9   :  { %v1121_v27 = vadd.f32 %v3288_v61, %v1120_v26  ;;  %2672 = vmatprep.mubr.msk.f32.mxu1 %vm443_vm1, %v1157_v22 }
 0x2ca   :  { %2673 = vmatmul.mubr.msk.f32.gmra.mrb[76].mxu1 %vm443_vm1, %v1158_v24  ;;  %v1160_v29 = vmax.f32 %v1126_v25, 0.0 }
 0x2cb   :  { %v1159_v28 = vmax.f32 %v1121_v27, 0.0 }
 0x2cd   :  { %2675 = vmatprep.mubr.msk.f32.mxu1 %vm443_vm1, %v1159_v28 }
 0x2ce   :  { %2676 = vmatmul.mubr.msk.f32.gmra.mrb[78].mxu1 %vm443_vm1, %v1160_v29 }
 0x365   :  { %v2632_v31 = vpop.f32.mrb[48].mxu1 }
 0x366   :  { %v1340_v32 = vadd.f32 %v2632_v31, %v3357_v30  ;;  %v1334_v33 = vpop.f32.mrb[49].mxu1 }
 0x367   :  { %v1335_v61 = vadd.f32 %v3357_v30, %v1334_v33 }
 0x368   :  { %v1494_v36 = vmax.f32 %v1340_v32, 0.0 }
 0x369   :  { %v1493_v34 = vmax.f32 %v1335_v61, 0.0  ;;  %v2635_v35 = vpop.f32.mrb[50].mxu1 }
 0x36a   :  { %v1350_v37 = vadd.f32 %v2635_v35, %v3357_v30  ;;  %v1344_v38 = vpop.f32.mrb[51].mxu1 }
 0x36b   :  { %v1345_v39 = vadd.f32 %v3357_v30, %v1344_v38  ;;  %2686 = vmatprep.mubr.msk.f32.mxu0 %vm443_vm1, %v1493_v34 }
 0x36c   :  { %2687 = vmatmul.mubr.msk.f32.vlgmr.msra.gmra.mrb[48].mxu0 %vm443_vm1, %v1494_v36  ;;  %v1496_v42 = vmax.f32 %v1350_v37, 0.0 }
 0x36d   :  { %v1495_v40 = vmax.f32 %v1345_v39, 0.0  ;;  %v2638_v41 = vpop.f32.mrb[52].mxu1 }
 0x36e   :  { %v1360_v43 = vadd.f32 %v2638_v41, %v3357_v30  ;;  %v1354_v44 = vpop.f32.mrb[53].mxu1 }
 0x36f   :  { %v1355_v46 = vadd.f32 %v3357_v30, %v1354_v44  ;;  %2689 = vmatprep.mubr.msk.f32.mxu0 %vm443_vm1, %v1495_v40 }
 0x370   :  { %2690 = vmatmul.mubr.msk.f32.gmra.mrb[50].mxu0 %vm443_vm1, %v1496_v42  ;;  %v1498_v49 = vmax.f32 %v1360_v43, 0.0 }
 0x371   :  { %v1497_v47 = vmax.f32 %v1355_v46, 0.0  ;;  %v2641_v48 = vpop.f32.mrb[54].mxu1 }
 0x372   :  { %v1370_v50 = vadd.f32 %v2641_v48, %v3357_v30  ;;  %v1364_v51 = vpop.f32.mrb[55].mxu1 }
 0x373   :  { %v1365_v53 = vadd.f32 %v3357_v30, %v1364_v51  ;;  %2692 = vmatprep.mubr.msk.f32.mxu0 %vm443_vm1, %v1497_v47 }
 0x374   :  { %2693 = vmatmul.mubr.msk.f32.gmra.mrb[52].mxu0 %vm443_vm1, %v1498_v49  ;;  %v1500_v56 = vmax.f32 %v1370_v50, 0.0 }
 0x375   :  { %v1499_v54 = vmax.f32 %v1365_v53, 0.0  ;;  %v2644_v55 = vpop.f32.mrb[56].mxu1 }
 0x376   :  { %v1380_v52 = vadd.f32 %v2644_v55, %v3357_v30  ;;  %v1374_v20 = vpop.f32.mrb[57].mxu1 }
 0x377   :  { %v1375_v57 = vadd.f32 %v3357_v30, %v1374_v20  ;;  %2695 = vmatprep.mubr.msk.f32.mxu0 %vm443_vm1, %v1499_v54 }
 0x378   :  { %2696 = vmatmul.mubr.msk.f32.gmra.mrb[54].mxu0 %vm443_vm1, %v1500_v56  ;;  %v1502_v62 = vmax.f32 %v1380_v52, 0.0 }
 0x379   :  { %v1501_v58 = vmax.f32 %v1375_v57, 0.0  ;;  %v2647_v59 = vpop.f32.mrb[58].mxu1 }
 0x37a   :  { %v1390_v60 = vadd.f32 %v2647_v59, %v3357_v30  ;;  %v1384_v63 = vpop.f32.mrb[59].mxu1 }
 0x37b   :  { %v1385_v0 = vadd.f32 %v3357_v30, %v1384_v63  ;;  %2698 = vmatprep.mubr.msk.f32.mxu0 %vm443_vm1, %v1501_v58 }
 0x37c   :  { %2699 = vmatmul.mubr.msk.f32.gmra.mrb[56].mxu0 %vm443_vm1, %v1502_v62  ;;  %v1504_v3 = vmax.f32 %v1390_v60, 0.0 }
 0x37d   :  { %v1503_v1 = vmax.f32 %v1385_v0, 0.0  ;;  %v2650_v2 = vpop.f32.mrb[60].mxu1  ;;  %v3426_v0 = vld [vmem:[%s3598_s10] ss:$0 sm:$0xff] }
 0x37e   :  { %v1400_v4 = vadd.f32 %v2650_v2, %v3357_v30  ;;  %v1394_v5 = vpop.f32.mrb[61].mxu1 }
 0x37f   :  { %v1395_v6 = vadd.f32 %v3357_v30, %v1394_v5  ;;  %2701 = vmatprep.mubr.msk.f32.mxu0 %vm443_vm1, %v1503_v1 }
 0x380   :  { %2702 = vmatmul.mubr.msk.f32.gmra.mrb[58].mxu0 %vm443_vm1, %v1504_v3  ;;  %v1506_v9 = vmax.f32 %v1400_v4, 0.0 }
 0x381   :  { %v1505_v7 = vmax.f32 %v1395_v6, 0.0  ;;  %v2653_v8 = vpop.f32.mrb[62].mxu1 }
 0x382   :  { %v1410_v10 = vadd.f32 %v2653_v8, %v3357_v30  ;;  %v1404_v11 = vpop.f32.mrb[63].mxu1 }
 0x383   :  { %v1405_v12 = vadd.f32 %v3357_v30, %v1404_v11  ;;  %2704 = vmatprep.mubr.msk.f32.mxu0 %vm443_vm1, %v1505_v7 }
 0x384   :  { %2705 = vmatmul.mubr.msk.f32.gmra.mrb[60].mxu0 %vm443_vm1, %v1506_v9  ;;  %v1508_v15 = vmax.f32 %v1410_v10, 0.0 }
 0x385   :  { %v1507_v13 = vmax.f32 %v1405_v12, 0.0  ;;  %v2656_v14 = vpop.f32.mrb[64].mxu1 }
 0x386   :  { %v1420_v16 = vadd.f32 %v2656_v14, %v3357_v30  ;;  %v1414_v17 = vpop.f32.mrb[65].mxu1 }
 0x387   :  { %v1415_v45 = vadd.f32 %v3357_v30, %v1414_v17  ;;  %2707 = vmatprep.mubr.msk.f32.mxu0 %vm443_vm1, %v1507_v13 }
 0x388   :  { %2708 = vmatmul.mubr.msk.f32.gmra.mrb[62].mxu0 %vm443_vm1, %v1508_v15  ;;  %v1510_v21 = vmax.f32 %v1420_v16, 0.0 }
 0x389   :  { %v1509_v18 = vmax.f32 %v1415_v45, 0.0  ;;  %v2659_v19 = vpop.f32.mrb[66].mxu1 }
 0x38a   :  { %v1430_v22 = vadd.f32 %v2659_v19, %v3357_v30  ;;  %v1424_v23 = vpop.f32.mrb[67].mxu1 }
 0x38b   :  { %v1425_v24 = vadd.f32 %v3357_v30, %v1424_v23  ;;  %2710 = vmatprep.mubr.msk.f32.mxu0 %vm443_vm1, %v1509_v18 }
 0x38c   :  { %2711 = vmatmul.mubr.msk.f32.gmra.mrb[64].mxu0 %vm443_vm1, %v1510_v21  ;;  %v1512_v27 = vmax.f32 %v1430_v22, 0.0 }
 0x38d   :  { %v1511_v25 = vmax.f32 %v1425_v24, 0.0  ;;  %v2662_v26 = vpop.f32.mrb[68].mxu1 }
 0x38e   :  { %v1440_v28 = vadd.f32 %v2662_v26, %v3357_v30  ;;  %v1434_v29 = vpop.f32.mrb[69].mxu1 }
 0x38f   :  { %v1435_v31 = vadd.f32 %v3357_v30, %v1434_v29  ;;  %2713 = vmatprep.mubr.msk.f32.mxu0 %vm443_vm1, %v1511_v25 }
 0x390   :  { %2714 = vmatmul.mubr.msk.f32.gmra.mrb[66].mxu0 %vm443_vm1, %v1512_v27  ;;  %v1514_v61 = vmax.f32 %v1440_v28, 0.0 }
 0x391   :  { %v1513_v32 = vmax.f32 %v1435_v31, 0.0  ;;  %v2665_v33 = vpop.f32.mrb[70].mxu1 }
 0x392   :  { %v1450_v34 = vadd.f32 %v2665_v33, %v3357_v30  ;;  %v1444_v35 = vpop.f32.mrb[71].mxu1 }
 0x393   :  { %v1445_v36 = vadd.f32 %v3357_v30, %v1444_v35  ;;  %2716 = vmatprep.mubr.msk.f32.mxu0 %vm443_vm1, %v1513_v32 }
 0x394   :  { %2717 = vmatmul.mubr.msk.f32.gmra.mrb[68].mxu0 %vm443_vm1, %v1514_v61  ;;  %v1516_v39 = vmax.f32 %v1450_v34, 0.0 }
 0x395   :  { %v1515_v37 = vmax.f32 %v1445_v36, 0.0  ;;  %v2668_v38 = vpop.f32.mrb[72].mxu1 }
 0x396   :  { %v1460_v40 = vadd.f32 %v2668_v38, %v3357_v30  ;;  %v1454_v41 = vpop.f32.mrb[73].mxu1 }
 0x397   :  { %v1455_v42 = vadd.f32 %v3357_v30, %v1454_v41  ;;  %2719 = vmatprep.mubr.msk.f32.mxu0 %vm443_vm1, %v1515_v37 }
 0x398   :  { %2720 = vmatmul.mubr.msk.f32.gmra.mrb[70].mxu0 %vm443_vm1, %v1516_v39  ;;  %v1518_v46 = vmax.f32 %v1460_v40, 0.0 }
 0x399   :  { %v1517_v43 = vmax.f32 %v1455_v42, 0.0  ;;  %v2671_v44 = vpop.f32.mrb[74].mxu1 }
 0x39a   :  { %v1470_v47 = vadd.f32 %v2671_v44, %v3357_v30  ;;  %v1464_v48 = vpop.f32.mrb[75].mxu1 }
 0x39b   :  { %v1465_v49 = vadd.f32 %v3357_v30, %v1464_v48  ;;  %2722 = vmatprep.mubr.msk.f32.mxu0 %vm443_vm1, %v1517_v43 }
 0x39c   :  { %2723 = vmatmul.mubr.msk.f32.gmra.mrb[72].mxu0 %vm443_vm1, %v1518_v46  ;;  %v1520_v53 = vmax.f32 %v1470_v47, 0.0 }
 0x39d   :  { %v1519_v50 = vmax.f32 %v1465_v49, 0.0  ;;  %v2674_v51 = vpop.f32.mrb[76].mxu1 }
 0x39e   :  { %v1480_v54 = vadd.f32 %v2674_v51, %v3357_v30  ;;  %v1474_v55 = vpop.f32.mrb[77].mxu1 }
 0x39f   :  { %v1475_v56 = vadd.f32 %v3357_v30, %v1474_v55  ;;  %2725 = vmatprep.mubr.msk.f32.mxu0 %vm443_vm1, %v1519_v50 }
 0x3a0   :  { %2726 = vmatmul.mubr.msk.f32.gmra.mrb[74].mxu0 %vm443_vm1, %v1520_v53  ;;  %v1522_v57 = vmax.f32 %v1480_v54, 0.0 }
 0x3a1   :  { %v1521_v52 = vmax.f32 %v1475_v56, 0.0  ;;  %v2677_v20 = vpop.f32.mrb[78].mxu1 }
 0x3a2   :  { %v1490_v58 = vadd.f32 %v2677_v20, %v3357_v30  ;;  %v1484_v59 = vpop.f32.mrb[79].mxu1 }
 0x3a3   :  { %v1485_v62 = vadd.f32 %v3357_v30, %v1484_v59  ;;  %2728 = vmatprep.mubr.msk.f32.mxu0 %vm443_vm1, %v1521_v52 }
 0x3a4   :  { %2729 = vmatmul.mubr.msk.f32.gmra.mrb[76].mxu0 %vm443_vm1, %v1522_v57  ;;  %v1524_v63 = vmax.f32 %v1490_v58, 0.0 }
 0x3a5   :  { %v1523_v60 = vmax.f32 %v1485_v62, 0.0 }
 0x3a7   :  { %2731 = vmatprep.mubr.msk.f32.mxu0 %vm443_vm1, %v1523_v60 }
 0x3a8   :  { %2732 = vmatmul.mubr.msk.f32.gmra.mrb[78].mxu0 %vm443_vm1, %v1524_v63 }
 0x43f   :  { %v2688_v1 = vpop.f32.mrb[48].mxu0 }
 0x440   :  { %v1704_v2 = vadd.f32 %v2688_v1, %v3426_v0  ;;  %v1698_v3 = vpop.f32.mrb[49].mxu0 }
 0x441   :  { %v1699_v30 = vadd.f32 %v3426_v0, %v1698_v3 }
 0x442   :  { %v2252_v4 = vmul.f32 -1.442695, %v1704_v2 }
 0x443   :  { %v2251_v5 = vmul.f32 -1.442695, %v1699_v30  ;;  %v2691_v6 = vpop.f32.mrb[50].mxu0 }
 0x444   :  { %2768 = vpow2.f32 %v2252_v4  ;;  %v1714_v7 = vadd.f32 %v2691_v6, %v3426_v0  ;;  %v1708_v8 = vpop.f32.mrb[51].mxu0 }
 0x445   :  { %2770 = vpow2.f32 %v2251_v5  ;;  %v1709_v9 = vadd.f32 %v3426_v0, %v1708_v8 }
 0x446   :  { %v2254_v10 = vmul.f32 -1.442695, %v1714_v7 }
 0x447   :  { %v2253_v11 = vmul.f32 -1.442695, %v1709_v9  ;;  %v2694_v12 = vpop.f32.mrb[52].mxu0 }
 0x448   :  { %2772 = vpow2.f32 %v2254_v10  ;;  %v1724_v13 = vadd.f32 %v2694_v12, %v3426_v0  ;;  %v1718_v14 = vpop.f32.mrb[53].mxu0 }
 0x449   :  { %2774 = vpow2.f32 %v2253_v11  ;;  %v1719_v15 = vadd.f32 %v3426_v0, %v1718_v14 }
 0x44a   :  { %v2256_v16 = vmul.f32 -1.442695, %v1724_v13 }
 0x44b   :  { %v2255_v17 = vmul.f32 -1.442695, %v1719_v15  ;;  %v2697_v45 = vpop.f32.mrb[54].mxu0 }
 0x44c   :  { %2776 = vpow2.f32 %v2256_v16  ;;  %v1734_v18 = vadd.f32 %v2697_v45, %v3426_v0  ;;  %v1728_v19 = vpop.f32.mrb[55].mxu0 }
 0x44d   :  { %2778 = vpow2.f32 %v2255_v17  ;;  %v1729_v21 = vadd.f32 %v3426_v0, %v1728_v19 }
 0x44e   :  { %v2769_v22 = vpop.eup %2768  ;;  %v2258_v23 = vmul.f32 -1.442695, %v1734_v18 }
 0x44f   :  { %v2771_v24 = vpop.eup %2770  ;;  %v1954_v25 = vadd.f32 1.0, %v2769_v22  ;;  %v2257_v26 = vmul.f32 -1.442695, %v1729_v21  ;;  %v2700_v27 = vpop.f32.mrb[56].mxu0 }
 0x450   :  { %v1953_v28 = vadd.f32 1.0, %v2771_v24  ;;  %2780 = vpow2.f32 %v2258_v23  ;;  %v1744_v29 = vadd.f32 %v2700_v27, %v3426_v0  ;;  %v1738_v31 = vpop.f32.mrb[57].mxu0 }
 0x451   :  { %2782 = vrcp.f32 %v1954_v25  ;;  %v1739_v32 = vadd.f32 %v3426_v0, %v1738_v31 }
 0x452   :  { %v2773_v33 = vpop.eup %2772  ;;  %2784 = vrcp.f32 %v1953_v28  ;;  %v2260_v61 = vmul.f32 -1.442695, %v1744_v29 }
 0x453   :  { %v2775_v34 = vpop.eup %2774  ;;  %v1956_v35 = vadd.f32 1.0, %v2773_v33  ;;  %2786 = vpow2.f32 %v2257_v26  ;;  %v2259_v36 = vmul.f32 -1.442695, %v1739_v32  ;;  %v2703_v37 = vpop.f32.mrb[58].mxu0 }
 0x454   :  { %v1955_v38 = vadd.f32 1.0, %v2775_v34  ;;  %2788 = vpow2.f32 %v2260_v61  ;;  %v1754_v39 = vadd.f32 %v2703_v37, %v3426_v0  ;;  %v1748_v40 = vpop.f32.mrb[59].mxu0 }
 0x455   :  { %2790 = vrcp.f32 %v1956_v35  ;;  %v1749_v41 = vadd.f32 %v3426_v0, %v1748_v40 }
 0x456   :  { %v2777_v42 = vpop.eup %2776  ;;  %2792 = vrcp.f32 %v1955_v38  ;;  %v2262_v43 = vmul.f32 -1.442695, %v1754_v39 }
 0x457   :  { %v2779_v44 = vpop.eup %2778  ;;  %v1958_v46 = vadd.f32 1.0, %v2777_v42  ;;  %2794 = vpow2.f32 %v2259_v36  ;;  %v2261_v47 = vmul.f32 -1.442695, %v1749_v41  ;;  %v2706_v48 = vpop.f32.mrb[60].mxu0 }
 0x458   :  { %v1957_v49 = vadd.f32 1.0, %v2779_v44  ;;  %2796 = vpow2.f32 %v2262_v43  ;;  %v1764_v50 = vadd.f32 %v2706_v48, %v3426_v0  ;;  %v1758_v51 = vpop.f32.mrb[61].mxu0 }
 0x459   :  { %2798 = vrcp.f32 %v1958_v46  ;;  %v1759_v53 = vadd.f32 %v3426_v0, %v1758_v51 }
 0x45a   :  { %v2781_v54 = vpop.eup %2780  ;;  %2800 = vrcp.f32 %v1957_v49  ;;  %v2264_v55 = vmul.f32 -1.442695, %v1764_v50 }
 0x45b   :  { %v2783_v56 = vpop.eup %2782  ;;  %v1960_v52 = vadd.f32 1.0, %v2781_v54  ;;  %2802 = vpow2.f32 %v2261_v47  ;;  %v2263_v20 = vmul.f32 -1.442695, %v1759_v53  ;;  %v2709_v57 = vpop.f32.mrb[62].mxu0 }
 0x45c   :  { %v2785_v58 = vpop.eup %2784  ;;  %2051 = vst.msk [vmem:[%s3599_s11 + $0x8] sm:$0xff] %vm2049_vm2, %v2783_v56  ;;  %2804 = vpow2.f32 %v2264_v55  ;;  %v1774_v59 = vadd.f32 %v2709_v57, %v3426_v0  ;;  %v1768_v62 = vpop.f32.mrb[63].mxu0 }
 0x45d   :  { %v2787_v60 = vpop.eup %2786  ;;  %2050 = vst.msk [vmem:[%s3599_s11] sm:$0xff] %vm2049_vm2, %v2785_v58  ;;  %2806 = vrcp.f32 %v1960_v52  ;;  %v1769_v63 = vadd.f32 %v3426_v0, %v1768_v62 }
 0x45e   :  { %v2789_v1 = vpop.eup %2788  ;;  %v1959_v2 = vadd.f32 1.0, %v2787_v60  ;;  %2808 = vpow2.f32 %v2263_v20  ;;  %v2266_v3 = vmul.f32 -1.442695, %v1774_v59 }
 0x45f   :  { %v2791_v30 = vpop.eup %2790  ;;  %v1962_v4 = vadd.f32 1.0, %v2789_v1  ;;  %v2265_v5 = vmul.f32 -1.442695, %v1769_v63  ;;  %v2712_v6 = vpop.f32.mrb[64].mxu0 }
 0x460   :  { %v2793_v7 = vpop.eup %2792  ;;  %2053 = vst.msk [vmem:[%s3599_s11 + $0x18] sm:$0xff] %vm2049_vm2, %v2791_v30  ;;  %2810 = vrcp.f32 %v1959_v2  ;;  %v1784_v8 = vadd.f32 %v2712_v6, %v3426_v0  ;;  %v1778_v9 = vpop.f32.mrb[65].mxu0 }
 0x461   :  { %v2795_v10 = vpop.eup %2794  ;;  %2052 = vst.msk [vmem:[%s3599_s11 + $0x10] sm:$0xff] %vm2049_vm2, %v2793_v7  ;;  %2812 = vrcp.f32 %v1962_v4  ;;  %v1779_v11 = vadd.f32 %v3426_v0, %v1778_v9 }
 0x462   :  { %v2797_v12 = vpop.eup %2796  ;;  %v1961_v13 = vadd.f32 1.0, %v2795_v10  ;;  %2814 = vpow2.f32 %v2266_v3  ;;  %v2268_v14 = vmul.f32 -1.442695, %v1784_v8 }
 0x463   :  { %v2799_v15 = vpop.eup %2798  ;;  %v1964_v16 = vadd.f32 1.0, %v2797_v12  ;;  %2816 = vpow2.f32 %v2265_v5  ;;  %v2267_v17 = vmul.f32 -1.442695, %v1779_v11  ;;  %v2715_v45 = vpop.f32.mrb[66].mxu0 }
 0x464   :  { %v2801_v18 = vpop.eup %2800  ;;  %2055 = vst.msk [vmem:[%s3599_s11 + $0x28] sm:$0xff] %vm2049_vm2, %v2799_v15  ;;  %2818 = vrcp.f32 %v1961_v13  ;;  %v1794_v19 = vadd.f32 %v2715_v45, %v3426_v0  ;;  %v1788_v21 = vpop.f32.mrb[67].mxu0 }
 0x465   :  { %v2803_v22 = vpop.eup %2802  ;;  %2054 = vst.msk [vmem:[%s3599_s11 + $0x20] sm:$0xff] %vm2049_vm2, %v2801_v18  ;;  %2820 = vrcp.f32 %v1964_v16  ;;  %v1789_v23 = vadd.f32 %v3426_v0, %v1788_v21 }
 0x466   :  { %v2805_v24 = vpop.eup %2804  ;;  %v1963_v25 = vadd.f32 1.0, %v2803_v22  ;;  %2822 = vpow2.f32 %v2268_v14  ;;  %v2270_v26 = vmul.f32 -1.442695, %v1794_v19 }
 0x467   :  { %v2807_v27 = vpop.eup %2806  ;;  %v1966_v28 = vadd.f32 1.0, %v2805_v24  ;;  %2824 = vpow2.f32 %v2267_v17  ;;  %v2718_v29 = vpop.f32.mrb[68].mxu0  ;;  %v2269_v32 = vmul.f32 -1.442695, %v1789_v23 }
 0x468   :  { %v2809_v31 = vpop.eup %2808  ;;  %2057 = vst.msk [vmem:[%s3599_s11 + $0x38] sm:$0xff] %vm2049_vm2, %v2807_v27  ;;  %2826 = vrcp.f32 %v1963_v25  ;;  %v1804_v33 = vadd.f32 %v2718_v29, %v3426_v0  ;;  %v1798_v61 = vpop.f32.mrb[69].mxu0 }
 0x469   :  { %2828 = vrcp.f32 %v1966_v28  ;;  %v1965_v34 = vadd.f32 1.0, %v2809_v31  ;;  %v1799_v35 = vadd.f32 %v3426_v0, %v1798_v61 }
 0x46a   :  { %v2811_v36 = vpop.eup %2810  ;;  %2830 = vpow2.f32 %v2270_v26  ;;  %v2272_v37 = vmul.f32 -1.442695, %v1804_v33 }
 0x46b   :  { %v2813_v38 = vpop.eup %2812  ;;  %2056 = vst.msk [vmem:[%s3599_s11 + $0x30] sm:$0xff] %vm2049_vm2, %v2811_v36  ;;  %2832 = vrcp.f32 %v1965_v34  ;;  %v2271_v39 = vmul.f32 -1.442695, %v1799_v35  ;;  %v2721_v40 = vpop.f32.mrb[70].mxu0 }
 0x46c   :  { %v2815_v41 = vpop.eup %2814  ;;  %2059 = vst.msk [vmem:[%s3599_s11 + $0x48] sm:$0xff] %vm2049_vm2, %v2813_v38  ;;  %2834 = vpow2.f32 %v2269_v32  ;;  %v1814_v42 = vadd.f32 %v2721_v40, %v3426_v0  ;;  %v1808_v43 = vpop.f32.mrb[71].mxu0 }
 0x46d   :  { %v2817_v44 = vpop.eup %2816  ;;  %v1968_v46 = vadd.f32 1.0, %v2815_v41  ;;  %2836 = vpow2.f32 %v2272_v37  ;;  %v1809_v47 = vadd.f32 %v3426_v0, %v1808_v43 }
 0x46e   :  { %v2819_v48 = vpop.eup %2818  ;;  %v1967_v49 = vadd.f32 1.0, %v2817_v44  ;;  %2838 = vpow2.f32 %v2271_v39  ;;  %v2274_v50 = vmul.f32 -1.442695, %v1814_v42 }
 0x46f   :  { %v2821_v51 = vpop.eup %2820  ;;  %2058 = vst.msk [vmem:[%s3599_s11 + $0x40] sm:$0xff] %vm2049_vm2, %v2819_v48  ;;  %2840 = vrcp.f32 %v1968_v46  ;;  %v2273_v53 = vmul.f32 -1.442695, %v1809_v47  ;;  %v2724_v54 = vpop.f32.mrb[72].mxu0 }
 0x470   :  { %v2823_v55 = vpop.eup %2822  ;;  %2061 = vst.msk [vmem:[%s3599_s11 + $0x58] sm:$0xff] %vm2049_vm2, %v2821_v51  ;;  %2842 = vrcp.f32 %v1967_v49  ;;  %v1824_v56 = vadd.f32 %v2724_v54, %v3426_v0  ;;  %v1818_v52 = vpop.f32.mrb[73].mxu0 }
 0x471   :  { %v2825_v20 = vpop.eup %2824  ;;  %v1970_v57 = vadd.f32 1.0, %v2823_v55  ;;  %2844 = vpow2.f32 %v2274_v50  ;;  %v1819_v58 = vadd.f32 %v3426_v0, %v1818_v52 }
 0x472   :  { %v2827_v59 = vpop.eup %2826  ;;  %v1969_v62 = vadd.f32 1.0, %v2825_v20  ;;  %2846 = vpow2.f32 %v2273_v53  ;;  %v2276_v60 = vmul.f32 -1.442695, %v1824_v56 }
 0x473   :  { %v2829_v63 = vpop.eup %2828  ;;  %2060 = vst.msk [vmem:[%s3599_s11 + $0x50] sm:$0xff] %vm2049_vm2, %v2827_v59  ;;  %2848 = vrcp.f32 %v1970_v57  ;;  %v2275_v1 = vmul.f32 -1.442695, %v1819_v58  ;;  %v2727_v2 = vpop.f32.mrb[74].mxu0 }
 0x474   :  { %v2831_v3 = vpop.eup %2830  ;;  %2063 = vst.msk [vmem:[%s3599_s11 + $0x68] sm:$0xff] %vm2049_vm2, %v2829_v63  ;;  %2850 = vrcp.f32 %v1969_v62  ;;  %v1834_v30 = vadd.f32 %v2727_v2, %v3426_v0  ;;  %v1828_v4 = vpop.f32.mrb[75].mxu0 }
 0x475   :  { %v2833_v5 = vpop.eup %2832  ;;  %v1972_v6 = vadd.f32 1.0, %v2831_v3  ;;  %2852 = vpow2.f32 %v2276_v60  ;;  %v1829_v7 = vadd.f32 %v3426_v0, %v1828_v4 }
 0x476   :  { %v2835_v8 = vpop.eup %2834  ;;  %2062 = vst.msk [vmem:[%s3599_s11 + $0x60] sm:$0xff] %vm2049_vm2, %v2833_v5  ;;  %2854 = vpow2.f32 %v2275_v1  ;;  %v2278_v9 = vmul.f32 -1.442695, %v1834_v30 }
 0x477   :  { %v2837_v10 = vpop.eup %2836  ;;  %2856 = vrcp.f32 %v1972_v6  ;;  %v1971_v11 = vadd.f32 1.0, %v2835_v8  ;;  %v2730_v12 = vpop.f32.mrb[76].mxu0  ;;  %v2277_v15 = vmul.f32 -1.442695, %v1829_v7 }
 0x478   :  { %v2839_v13 = vpop.eup %2838  ;;  %v1974_v14 = vadd.f32 1.0, %v2837_v10  ;;  %2858 = vpow2.f32 %v2278_v9  ;;  %v1844_v16 = vadd.f32 %v2730_v12, %v3426_v0  ;;  %v1838_v17 = vpop.f32.mrb[77].mxu0 }
 0x479   :  { %v2841_v45 = vpop.eup %2840  ;;  %2860 = vrcp.f32 %v1971_v11  ;;  %v1973_v18 = vadd.f32 1.0, %v2839_v13  ;;  %v1839_v19 = vadd.f32 %v3426_v0, %v1838_v17 }
 0x47a   :  { %v2843_v21 = vpop.eup %2842  ;;  %2065 = vst.msk [vmem:[%s3599_s11 + $0x78] sm:$0xff] %vm2049_vm2, %v2841_v45  ;;  %2862 = vrcp.f32 %v1974_v14  ;;  %v2280_v22 = vmul.f32 -1.442695, %v1844_v16 }
 0x47b   :  { %v2845_v23 = vpop.eup %2844  ;;  %2064 = vst.msk [vmem:[%s3599_s11 + $0x70] sm:$0xff] %vm2049_vm2, %v2843_v21  ;;  %2864 = vrcp.f32 %v1973_v18  ;;  %v2733_v24 = vpop.f32.mrb[78].mxu0  ;;  %v2279_v27 = vmul.f32 -1.442695, %v1839_v19 }
 0x47c   :  { %v2847_v25 = vpop.eup %2846  ;;  %v1976_v26 = vadd.f32 1.0, %v2845_v23  ;;  %2866 = vpow2.f32 %v2277_v15  ;;  %v1854_v28 = vadd.f32 %v2733_v24, %v3426_v0  ;;  %v1848_v29 = vpop.f32.mrb[79].mxu0 }
 0x47d   :  { %v2849_v31 = vpop.eup %2848  ;;  %v1975_v32 = vadd.f32 1.0, %v2847_v25  ;;  %2868 = vpow2.f32 %v2280_v22  ;;  %v1849_v33 = vadd.f32 %v3426_v0, %v1848_v29 }
 0x47e   :  { %v2851_v61 = vpop.eup %2850  ;;  %2067 = vst.msk [vmem:[%s3599_s11 + $0x88] sm:$0xff] %vm2049_vm2, %v2849_v31  ;;  %2870 = vrcp.f32 %v1976_v26  ;;  %v2282_v34 = vmul.f32 -1.442695, %v1854_v28 }
 0x47f   :  { %v2853_v35 = vpop.eup %2852  ;;  %2066 = vst.msk [vmem:[%s3599_s11 + $0x80] sm:$0xff] %vm2049_vm2, %v2851_v61  ;;  %2872 = vrcp.f32 %v1975_v32  ;;  %v2281_v38 = vmul.f32 -1.442695, %v1849_v33 }
 0x480   :  { %v2855_v36 = vpop.eup %2854  ;;  %v1978_v37 = vadd.f32 1.0, %v2853_v35  ;;  %2874 = vpow2.f32 %v2279_v27 }
 0x481   :  { %v2857_v0 = vpop.eup %2856  ;;  %v1977_v39 = vadd.f32 1.0, %v2855_v36  ;;  %2876 = vpow2.f32 %v2282_v34 }
 0x482   :  { %v2859_v40 = vpop.eup %2858  ;;  %2069 = vst.msk [vmem:[%s3599_s11 + $0x98] sm:$0xff] %vm2049_vm2, %v2857_v0  ;;  %2878 = vrcp.f32 %v1978_v37 }
 0x483   :  { %v2861_v41 = vpop.eup %2860  ;;  %2880 = vrcp.f32 %v1977_v39  ;;  %v1980_v42 = vadd.f32 1.0, %v2859_v40 }
 0x484   :  { %v2863_v43 = vpop.eup %2862  ;;  %2068 = vst.msk [vmem:[%s3599_s11 + $0x90] sm:$0xff] %vm2049_vm2, %v2861_v41  ;;  %2882 = vpow2.f32 %v2281_v38 }
 0x485   :  { %v2865_v44 = vpop.eup %2864  ;;  %2071 = vst.msk [vmem:[%s3599_s11 + $0xa8] sm:$0xff] %vm2049_vm2, %v2863_v43  ;;  %2884 = vrcp.f32 %v1980_v42 }
 0x486   :  { %v2867_v46 = vpop.eup %2866  ;;  %2070 = vst.msk [vmem:[%s3599_s11 + $0xa0] sm:$0xff] %vm2049_vm2, %v2865_v44 }
 0x487   :  { %v2869_v47 = vpop.eup %2868  ;;  %v1979_v48 = vadd.f32 1.0, %v2867_v46 }
 0x488   :  { %v2871_v49 = vpop.eup %2870  ;;  %v1982_v50 = vadd.f32 1.0, %v2869_v47 }
 0x489   :  { %v2873_v51 = vpop.eup %2872  ;;  %2073 = vst.msk [vmem:[%s3599_s11 + $0xb8] sm:$0xff] %vm2049_vm2, %v2871_v49  ;;  %2886 = vrcp.f32 %v1979_v48 }
 0x48a   :  { %v2875_v53 = vpop.eup %2874  ;;  %2072 = vst.msk [vmem:[%s3599_s11 + $0xb0] sm:$0xff] %vm2049_vm2, %v2873_v51  ;;  %2888 = vrcp.f32 %v1982_v50 }
 0x48b   :  { %v2877_v54 = vpop.eup %2876  ;;  %v1981_v55 = vadd.f32 1.0, %v2875_v53 }
 0x48c   :  { %v2879_v56 = vpop.eup %2878  ;;  %v1984_v52 = vadd.f32 1.0, %v2877_v54 }
 0x48d   :  { %v2881_v20 = vpop.eup %2880  ;;  %2075 = vst.msk [vmem:[%s3599_s11 + $0xc8] sm:$0xff] %vm2049_vm2, %v2879_v56  ;;  %2890 = vrcp.f32 %v1981_v55 }
 0x48e   :  { %v2883_v57 = vpop.eup %2882  ;;  %2074 = vst.msk [vmem:[%s3599_s11 + $0xc0] sm:$0xff] %vm2049_vm2, %v2881_v20  ;;  %2892 = vrcp.f32 %v1984_v52 }
 0x48f   :  { %v2885_v58 = vpop.eup %2884  ;;  %v1983_v59 = vadd.f32 1.0, %v2883_v57 }
 0x490   :  { %2077 = vst.msk [vmem:[%s3599_s11 + $0xd8] sm:$0xff] %vm2049_vm2, %v2885_v58 }
 0x491   :  { %2894 = vrcp.f32 %v1983_v59 }
 0x493   :  { %v2887_v62 = vpop.eup %2886 }
 0x494   :  { %v2889_v60 = vpop.eup %2888  ;;  %2076 = vst.msk [vmem:[%s3599_s11 + $0xd0] sm:$0xff] %vm2049_vm2, %v2887_v62 }
 0x495   :  { %2079 = vst.msk [vmem:[%s3599_s11 + $0xe8] sm:$0xff] %vm2049_vm2, %v2889_v60 }
 0x497   :  { %v2891_v63 = vpop.eup %2890 }
 0x498   :  { %v2893_v1 = vpop.eup %2892  ;;  %2078 = vst.msk [vmem:[%s3599_s11 + $0xe0] sm:$0xff] %vm2049_vm2, %v2891_v63 }
 0x499   :  { %2081 = vst.msk [vmem:[%s3599_s11 + $0xf8] sm:$0xff] %vm2049_vm2, %v2893_v1 }
 0x49b   :  { %v2895_v2 = vpop.eup %2894 }
 0x49c   :  { %2080 = vst.msk [vmem:[%s3599_s11 + $0xf0] sm:$0xff] %vm2049_vm2, %v2895_v2 }

</bundles_post_ra>
